<compile_context>
chip_gen: v7x
topology: tpu7x:2x2x1
jax: 0.10.0
libtpu: 0.0.40
codegen_flags: <defaults>
</compile_context>

<pallas_src>
import functools

import jax
import jax.numpy as jnp
from jax.experimental import pallas as pl
from jax.experimental.pallas import tpu as pltpu


def _round_up(x, m):
    return ((x + m - 1) // m) * m


def encoder_gru_kernel(x_ref, h0_ref, wih_ref, whh_ref, bif_ref, bhn_ref,
                       out_ref, gi_scr, *, hp, seq_len, unroll):
    """Whole-sequence GRU in one kernel invocation.

    x_ref   : VMEM (Tp, Hp)  bf16 -- gathered embedding rows (padded rows = 0)
    h0_ref  : VMEM (1, Hp)   f32  -- initial hidden state (padded lanes = 0)
    wih_ref : VMEM (Hp, 3Hp) bf16 -- W_ih^T, gate-banded [r|z|n]
    whh_ref : VMEM (Hp, 3Hp) bf16 -- W_hh^T, gate-banded [r|z|n]
    bif_ref : VMEM (1, 3Hp)  f32  -- folded bias [b_ih_r+b_hh_r | b_ih_z+b_hh_z | b_ih_n]
    bhn_ref : VMEM (1, Hp)   f32  -- b_hh_n (must stay inside the r*(...) term)
    out_ref : VMEM (1, Hp)   f32  -- final hidden state
    gi_scr  : VMEM (Tp, 3Hp) f32  -- all-timestep input projections
    """
    # ---- Prologue: sequence-wide input projection, ONE MXU matmul ----------
    gi_scr[...] = (
        jnp.dot(x_ref[...], wih_ref[...], preferred_element_type=jnp.float32)
        + bif_ref[...])

    # ---- Recurrence: hidden state carried in vregs --------------------------
    def step(i, h):
        gi = gi_scr[pl.ds(i, 1), :]                               # (1, 3Hp) f32
        gh = jnp.dot(h.astype(jnp.bfloat16), whh_ref[...],
                     preferred_element_type=jnp.float32)          # (1, 3Hp) f32
        # PyTorch GRU cell (gate order r, z, n); every slice is 128-aligned.
        r = jax.nn.sigmoid(gi[:, 0:hp] + gh[:, 0:hp])
        z = jax.nn.sigmoid(gi[:, hp:2 * hp] + gh[:, hp:2 * hp])
        n = jnp.tanh(gi[:, 2 * hp:3 * hp]
                     + r * (gh[:, 2 * hp:3 * hp] + bhn_ref[...]))
        return (1.0 - z) * n + z * h

    h_final = jax.lax.fori_loop(0, seq_len, step, h0_ref[...], unroll=unroll)
    out_ref[...] = h_final


def prepare_encoder_params(emb, w_ih, w_hh, b_ih, b_hh):
    """One-time parameter prep: transpose, gate-band pad, bf16 cast, bias fold.

    emb: (V, H); w_ih/w_hh: (3H, H) PyTorch layout; b_ih/b_hh: (3H,).
    Each gate occupies its own Hp-wide lane band; padded entries are zero.
    """
    f32, bf16 = jnp.float32, jnp.bfloat16
    V, H = emb.shape
    Hp = _round_up(H, 128)

    emb_p = jnp.zeros((V, Hp), bf16).at[:, :H].set(emb.astype(bf16))

    wi_t = jnp.transpose(w_ih).astype(bf16)   # (H, 3H), cols = [r|z|n]
    wh_t = jnp.transpose(w_hh).astype(bf16)

    wih_p = jnp.zeros((Hp, 3 * Hp), bf16)
    whh_p = jnp.zeros((Hp, 3 * Hp), bf16)
    for g in range(3):
        wih_p = wih_p.at[:H, g * Hp:g * Hp + H].set(wi_t[:, g * H:(g + 1) * H])
        whh_p = whh_p.at[:H, g * Hp:g * Hp + H].set(wh_t[:, g * H:(g + 1) * H])

    # Folded prologue bias: r/z bands get b_ih+b_hh, n band gets b_ih only.
    bif = jnp.zeros((1, 3 * Hp), f32)
    bif = bif.at[0, 0:H].set((b_ih[0:H] + b_hh[0:H]).astype(f32))
    bif = bif.at[0, Hp:Hp + H].set((b_ih[H:2 * H] + b_hh[H:2 * H]).astype(f32))
    bif = bif.at[0, 2 * Hp:2 * Hp + H].set(b_ih[2 * H:3 * H].astype(f32))
    # n-gate hidden bias stays per-step (inside r * (...)).
    bhn = jnp.zeros((1, Hp), f32).at[0, :H].set(b_hh[2 * H:3 * H].astype(f32))

    return {"emb": emb_p, "wih": wih_p, "whh": whh_p, "bif": bif, "bhn": bhn,
            "H": H, "Hp": Hp, "V": V}


def encoder_rnn_sequence(tokens, hidden0, params):
    """Run the GRU over a whole token sequence (EncoderRNN.sample semantics).

    tokens: int32[T]; hidden0: f32[1,1,H]; returns final hidden f32[1,1,H].
    """
    H, Hp, V = params["H"], params["Hp"], params["V"]
    tokens = jnp.clip(tokens.astype(jnp.int32).reshape(-1), 0, V - 1)  # OOB guard
    T = int(tokens.shape[0])
    Tp = _round_up(max(T, 1), 8)

    # Gather all embedding rows once (tiny slab) instead of T per-step DMAs.
    x_all = jnp.take(params["emb"], tokens, axis=0)                    # (T, Hp) bf16
    x_all = jnp.zeros((Tp, Hp), jnp.bfloat16).at[:T].set(x_all)

    h0 = jnp.zeros((1, Hp), jnp.float32).at[:, :H].set(
        hidden0.reshape(1, H).astype(jnp.float32))

    kernel = functools.partial(encoder_gru_kernel, hp=Hp, seq_len=T,
                               unroll=(T <= 32))

    h_out = pl.pallas_call(
        kernel,
        out_shape=jax.ShapeDtypeStruct((1, Hp), jnp.float32),
        grid=(1,),
        in_specs=[
            pl.BlockSpec((Tp, Hp), lambda i: (0, 0)),        # embeddings
            pl.BlockSpec((1, Hp), lambda i: (0, 0)),         # h0
            pl.BlockSpec((Hp, 3 * Hp), lambda i: (0, 0)),    # W_ih^T
            pl.BlockSpec((Hp, 3 * Hp), lambda i: (0, 0)),    # W_hh^T
            pl.BlockSpec((1, 3 * Hp), lambda i: (0, 0)),     # folded bias
            pl.BlockSpec((1, Hp), lambda i: (0, 0)),         # b_hh (n gate)
        ],
        out_specs=pl.BlockSpec((1, Hp), lambda i: (0, 0)),
        scratch_shapes=[pltpu.VMEM((Tp, 3 * Hp), jnp.float32)],  # gi for all steps
        compiler_params=pltpu.CompilerParams(
            dimension_semantics=("arbitrary",)),
    )(x_all, h0, params["wih"], params["whh"], params["bif"], params["bhn"])

    return h_out[:, :H].reshape(1, 1, H)


def encoder_rnn_forward(token, hidden, params):
    """Matches EncoderRNN.forward: one token, returns new hidden (1,1,H)."""
    return encoder_rnn_sequence(token.reshape(1), hidden, params)


def encoder_rnn_reference(tokens, hidden, emb, w_ih, w_hh, b_ih, b_hh):
    """Pure-JAX f32 reference of the same multi-step forward pass."""
    H = hidden.shape[-1]
    h = hidden.reshape(1, H).astype(jnp.float32)

    def step(h, tok):
        x = emb[tok].reshape(1, H)
        gi = x @ w_ih.T + b_ih
        gh = h @ w_hh.T + b_hh
        r = jax.nn.sigmoid(gi[:, 0:H] + gh[:, 0:H])
        z = jax.nn.sigmoid(gi[:, H:2 * H] + gh[:, H:2 * H])
        n = jnp.tanh(gi[:, 2 * H:3 * H] + r * gh[:, 2 * H:3 * H])
        return (1.0 - z) * n + z * h, None

    h, _ = jax.lax.scan(step, h, tokens)
    return h.reshape(1, 1, H)


if __name__ == "__main__":
    INPUT_SIZE = 16   # vocabulary size
    HIDDEN = 32       # hidden_size
    SEQ_LEN = 8

    key = jax.random.PRNGKey(0)
    k_emb, k_wi, k_wh, k_bi, k_bh, k_tok = jax.random.split(key, 6)

    scale = 1.0 / jnp.sqrt(jnp.float32(HIDDEN))
    emb = jax.random.normal(k_emb, (INPUT_SIZE, HIDDEN), jnp.float32)
    w_ih = jax.random.uniform(k_wi, (3 * HIDDEN, HIDDEN), jnp.float32,
                              minval=-scale, maxval=scale)
    w_hh = jax.random.uniform(k_wh, (3 * HIDDEN, HIDDEN), jnp.float32,
                              minval=-scale, maxval=scale)
    b_ih = jax.random.uniform(k_bi, (3 * HIDDEN,), jnp.float32,
                              minval=-scale, maxval=scale)
    b_hh = jax.random.uniform(k_bh, (3 * HIDDEN,), jnp.float32,
                              minval=-scale, maxval=scale)

    tokens = jax.random.randint(k_tok, (SEQ_LEN,), 0, INPUT_SIZE, jnp.int32)
    hidden0 = jnp.zeros((1, 1, HIDDEN), jnp.float32)   # initHidden()

    # One-time parameter preparation (hoisted out of the per-call path).
    params = prepare_encoder_params(emb, w_ih, w_hh, b_ih, b_hh)
    params = jax.tree_util.tree_map(jax.block_until_ready, params)

    # Full-sequence run (EncoderRNN.sample semantics): one pallas_call.
    h_seq = encoder_rnn_sequence(tokens, hidden0, params)
    h_seq = jax.block_until_ready(h_seq)
    h_seq_ref = encoder_rnn_reference(tokens, hidden0, emb, w_ih, w_hh, b_ih, b_hh)
    assert h_seq.shape == (1, 1, HIDDEN)
    # bf16 MXU operands -> slightly looser tolerance than the f32 reference.
    assert jnp.allclose(h_seq, h_seq_ref, atol=2e-2, rtol=2e-2)

    # Single-step run (EncoderRNN.forward semantics).
    h1 = encoder_rnn_forward(tokens[0:1], hidden0, params)
    h1 = jax.block_until_ready(h1)
    h1_ref = encoder_rnn_reference(tokens[0:1], hidden0, emb, w_ih, w_hh, b_ih, b_hh)
    assert jnp.allclose(h1, h1_ref, atol=2e-2, rtol=2e-2)

    print("KERNEL_OK")
</pallas_src>

<mosaic_0001>
module attributes {stable_mosaic.version = 11 : i64} {
  func.func @encoder_gru_kernel(%arg0: i32, %arg1: memref<8x128xbf16, #tpu.memory_space<vmem>>, %arg2: memref<1x128xf32, #tpu.memory_space<vmem>>, %arg3: memref<128x384xbf16, #tpu.memory_space<vmem>>, %arg4: memref<128x384xbf16, #tpu.memory_space<vmem>>, %arg5: memref<1x384xf32, #tpu.memory_space<vmem>>, %arg6: memref<1x128xf32, #tpu.memory_space<vmem>>, %arg7: memref<1x128xf32, #tpu.memory_space<vmem>>, %arg8: memref<8x384xf32, #tpu.memory_space<vmem>>) attributes {dimension_semantics = [#tpu.dimension_semantics<arbitrary>], iteration_bounds = array<i64: 1>, scalar_prefetch = 0 : i64, scratch_operands = 1 : i64, tpu.core_type = #tpu.core_type<tc>, window_params = [{pipeline_mode = #tpu.pipeline_mode<synchronous>, transform_indices = @transform_0, window_bounds = array<i64: 8, 128>}, {pipeline_mode = #tpu.pipeline_mode<synchronous>, transform_indices = @transform_1, window_bounds = array<i64: 1, 128>}, {pipeline_mode = #tpu.pipeline_mode<synchronous>, transform_indices = @transform_2, window_bounds = array<i64: 128, 384>}, {pipeline_mode = #tpu.pipeline_mode<synchronous>, transform_indices = @transform_3, window_bounds = array<i64: 128, 384>}, {pipeline_mode = #tpu.pipeline_mode<synchronous>, transform_indices = @transform_4, window_bounds = array<i64: 1, 384>}, {pipeline_mode = #tpu.pipeline_mode<synchronous>, transform_indices = @transform_5, window_bounds = array<i64: 1, 128>}, {pipeline_mode = #tpu.pipeline_mode<synchronous>, transform_indices = @transform_6, window_bounds = array<i64: 1, 128>}]} {
    %c0 = arith.constant 0 : index
    %c0_0 = arith.constant 0 : index
    %0 = vector.load %arg1[%c0, %c0_0] : memref<8x128xbf16, #tpu.memory_space<vmem>>, vector<8x128xbf16>
    %c0_1 = arith.constant 0 : index
    %c0_2 = arith.constant 0 : index
    %1 = vector.load %arg3[%c0_1, %c0_2] : memref<128x384xbf16, #tpu.memory_space<vmem>>, vector<128x384xbf16>
    %cst = arith.constant dense<0.000000e+00> : vector<8x384xf32>
    %2 = tpu.matmul %0, %1, %cst {dimension_numbers = #tpu.dot_dimension_numbers<[1], [0], [0], [1], [0, 0, 1, 1], [], []>} : vector<8x128xbf16>, vector<128x384xbf16>, vector<8x384xf32> -> vector<8x384xf32>
    %c0_3 = arith.constant 0 : index
    %c0_4 = arith.constant 0 : index
    %3 = vector.load %arg5[%c0_3, %c0_4] : memref<1x384xf32, #tpu.memory_space<vmem>>, vector<1x384xf32>
    %4 = vector.broadcast %3 : vector<1x384xf32> to vector<8x384xf32>
    %5 = arith.addf %2, %4 : vector<8x384xf32>
    %c0_5 = arith.constant 0 : index
    %c0_6 = arith.constant 0 : index
    %6 = vector.load %arg8[%c0_5, %c0_6] : memref<8x384xf32, #tpu.memory_space<vmem>>, vector<8x384xf32>
    tpu.vector_store %arg8[%c0_5, %c0_6], %5 {strides = array<i32>} : memref<8x384xf32, #tpu.memory_space<vmem>>, vector<8x384xf32>,
    %c0_7 = arith.constant 0 : index
    %c0_8 = arith.constant 0 : index
    %7 = vector.load %arg2[%c0_7, %c0_8] : memref<1x128xf32, #tpu.memory_space<vmem>>, vector<1x128xf32>
    %c0_i32 = arith.constant 0 : i32
    %8 = arith.index_cast %c0_i32 : i32 to index
    %c0_9 = arith.constant 0 : index
    %9 = vector.load %arg8[%8, %c0_9] : memref<8x384xf32, #tpu.memory_space<vmem>>, vector<1x384xf32>
    %10 = arith.truncf %7 : vector<1x128xf32> to vector<1x128xbf16>
    %c0_10 = arith.constant 0 : index
    %c0_11 = arith.constant 0 : index
    %11 = vector.load %arg4[%c0_10, %c0_11] : memref<128x384xbf16, #tpu.memory_space<vmem>>, vector<128x384xbf16>
    %cst_12 = arith.constant dense<0.000000e+00> : vector<1x384xf32>
    %12 = tpu.matmul %10, %11, %cst_12 {dimension_numbers = #tpu.dot_dimension_numbers<[1], [0], [0], [1], [0, 0, 1, 1], [], []>} : vector<1x128xbf16>, vector<128x384xbf16>, vector<1x384xf32> -> vector<1x384xf32>
    %13 = vector.extract_strided_slice %9 {offsets = [0, 0], sizes = [1, 128], strides = [1, 1]} : vector<1x384xf32> to vector<1x128xf32>
    %14 = vector.extract_strided_slice %12 {offsets = [0, 0], sizes = [1, 128], strides = [1, 1]} : vector<1x384xf32> to vector<1x128xf32>
    %15 = arith.addf %13, %14 : vector<1x128xf32>
    %16 = arith.negf %15 : vector<1x128xf32>
    %17 = math.exp %16 : vector<1x128xf32>
    %cst_13 = arith.constant 1.000000e+00 : f32
    %18 = vector.broadcast %cst_13 : f32 to vector<1x128xf32>
    %19 = arith.addf %18, %17 : vector<1x128xf32>
    %20 = arith.divf %18, %19 : vector<1x128xf32>
    %21 = vector.extract_strided_slice %9 {offsets = [0, 128], sizes = [1, 128], strides = [1, 1]} : vector<1x384xf32> to vector<1x128xf32>
    %22 = vector.extract_strided_slice %12 {offsets = [0, 128], sizes = [1, 128], strides = [1, 1]} : vector<1x384xf32> to vector<1x128xf32>
    %23 = arith.addf %21, %22 : vector<1x128xf32>
    %24 = arith.negf %23 : vector<1x128xf32>
    %25 = math.exp %24 : vector<1x128xf32>
    %cst_14 = arith.constant 1.000000e+00 : f32
    %26 = vector.broadcast %cst_14 : f32 to vector<1x128xf32>
    %27 = arith.addf %26, %25 : vector<1x128xf32>
    %28 = arith.divf %26, %27 : vector<1x128xf32>
    %29 = vector.extract_strided_slice %9 {offsets = [0, 256], sizes = [1, 128], strides = [1, 1]} : vector<1x384xf32> to vector<1x128xf32>
    %30 = vector.extract_strided_slice %12 {offsets = [0, 256], sizes = [1, 128], strides = [1, 1]} : vector<1x384xf32> to vector<1x128xf32>
    %c0_15 = arith.constant 0 : index
    %c0_16 = arith.constant 0 : index
    %31 = vector.load %arg6[%c0_15, %c0_16] : memref<1x128xf32, #tpu.memory_space<vmem>>, vector<1x128xf32>
    %32 = arith.addf %30, %31 : vector<1x128xf32>
    %33 = arith.mulf %20, %32 : vector<1x128xf32>
    %34 = arith.addf %29, %33 : vector<1x128xf32>
    %35 = math.tanh %34 : vector<1x128xf32>
    %cst_17 = arith.constant 1.000000e+00 : f32
    %36 = vector.broadcast %cst_17 : f32 to vector<1x128xf32>
    %37 = arith.subf %36, %28 : vector<1x128xf32>
    %38 = arith.mulf %37, %35 : vector<1x128xf32>
    %39 = arith.mulf %28, %7 : vector<1x128xf32>
    %40 = arith.addf %38, %39 : vector<1x128xf32>
    %c1_i32 = arith.constant 1 : i32
    %41 = arith.index_cast %c1_i32 : i32 to index
    %c0_18 = arith.constant 0 : index
    %42 = vector.load %arg8[%41, %c0_18] : memref<8x384xf32, #tpu.memory_space<vmem>>, vector<1x384xf32>
    %43 = arith.truncf %40 : vector<1x128xf32> to vector<1x128xbf16>
    %c0_19 = arith.constant 0 : index
    %c0_20 = arith.constant 0 : index
    %44 = vector.load %arg4[%c0_19, %c0_20] : memref<128x384xbf16, #tpu.memory_space<vmem>>, vector<128x384xbf16>
    %cst_21 = arith.constant dense<0.000000e+00> : vector<1x384xf32>
    %45 = tpu.matmul %43, %44, %cst_21 {dimension_numbers = #tpu.dot_dimension_numbers<[1], [0], [0], [1], [0, 0, 1, 1], [], []>} : vector<1x128xbf16>, vector<128x384xbf16>, vector<1x384xf32> -> vector<1x384xf32>
    %46 = vector.extract_strided_slice %42 {offsets = [0, 0], sizes = [1, 128], strides = [1, 1]} : vector<1x384xf32> to vector<1x128xf32>
    %47 = vector.extract_strided_slice %45 {offsets = [0, 0], sizes = [1, 128], strides = [1, 1]} : vector<1x384xf32> to vector<1x128xf32>
    %48 = arith.addf %46, %47 : vector<1x128xf32>
    %49 = arith.negf %48 : vector<1x128xf32>
    %50 = math.exp %49 : vector<1x128xf32>
    %cst_22 = arith.constant 1.000000e+00 : f32
    %51 = vector.broadcast %cst_22 : f32 to vector<1x128xf32>
    %52 = arith.addf %51, %50 : vector<1x128xf32>
    %53 = arith.divf %51, %52 : vector<1x128xf32>
    %54 = vector.extract_strided_slice %42 {offsets = [0, 128], sizes = [1, 128], strides = [1, 1]} : vector<1x384xf32> to vector<1x128xf32>
    %55 = vector.extract_strided_slice %45 {offsets = [0, 128], sizes = [1, 128], strides = [1, 1]} : vector<1x384xf32> to vector<1x128xf32>
    %56 = arith.addf %54, %55 : vector<1x128xf32>
    %57 = arith.negf %56 : vector<1x128xf32>
    %58 = math.exp %57 : vector<1x128xf32>
    %cst_23 = arith.constant 1.000000e+00 : f32
    %59 = vector.broadcast %cst_23 : f32 to vector<1x128xf32>
    %60 = arith.addf %59, %58 : vector<1x128xf32>
    %61 = arith.divf %59, %60 : vector<1x128xf32>
    %62 = vector.extract_strided_slice %42 {offsets = [0, 256], sizes = [1, 128], strides = [1, 1]} : vector<1x384xf32> to vector<1x128xf32>
    %63 = vector.extract_strided_slice %45 {offsets = [0, 256], sizes = [1, 128], strides = [1, 1]} : vector<1x384xf32> to vector<1x128xf32>
    %c0_24 = arith.constant 0 : index
    %c0_25 = arith.constant 0 : index
    %64 = vector.load %arg6[%c0_24, %c0_25] : memref<1x128xf32, #tpu.memory_space<vmem>>, vector<1x128xf32>
    %65 = arith.addf %63, %64 : vector<1x128xf32>
    %66 = arith.mulf %53, %65 : vector<1x128xf32>
    %67 = arith.addf %62, %66 : vector<1x128xf32>
    %68 = math.tanh %67 : vector<1x128xf32>
    %cst_26 = arith.constant 1.000000e+00 : f32
    %69 = vector.broadcast %cst_26 : f32 to vector<1x128xf32>
    %70 = arith.subf %69, %61 : vector<1x128xf32>
    %71 = arith.mulf %70, %68 : vector<1x128xf32>
    %72 = arith.mulf %61, %40 : vector<1x128xf32>
    %73 = arith.addf %71, %72 : vector<1x128xf32>
    %c2_i32 = arith.constant 2 : i32
    %74 = arith.index_cast %c2_i32 : i32 to index
    %c0_27 = arith.constant 0 : index
    %75 = vector.load %arg8[%74, %c0_27] : memref<8x384xf32, #tpu.memory_space<vmem>>, vector<1x384xf32>
    %76 = arith.truncf %73 : vector<1x128xf32> to vector<1x128xbf16>
    %c0_28 = arith.constant 0 : index
    %c0_29 = arith.constant 0 : index
    %77 = vector.load %arg4[%c0_28, %c0_29] : memref<128x384xbf16, #tpu.memory_space<vmem>>, vector<128x384xbf16>
    %cst_30 = arith.constant dense<0.000000e+00> : vector<1x384xf32>
    %78 = tpu.matmul %76, %77, %cst_30 {dimension_numbers = #tpu.dot_dimension_numbers<[1], [0], [0], [1], [0, 0, 1, 1], [], []>} : vector<1x128xbf16>, vector<128x384xbf16>, vector<1x384xf32> -> vector<1x384xf32>
    %79 = vector.extract_strided_slice %75 {offsets = [0, 0], sizes = [1, 128], strides = [1, 1]} : vector<1x384xf32> to vector<1x128xf32>
    %80 = vector.extract_strided_slice %78 {offsets = [0, 0], sizes = [1, 128], strides = [1, 1]} : vector<1x384xf32> to vector<1x128xf32>
    %81 = arith.addf %79, %80 : vector<1x128xf32>
    %82 = arith.negf %81 : vector<1x128xf32>
    %83 = math.exp %82 : vector<1x128xf32>
    %cst_31 = arith.constant 1.000000e+00 : f32
    %84 = vector.broadcast %cst_31 : f32 to vector<1x128xf32>
    %85 = arith.addf %84, %83 : vector<1x128xf32>
    %86 = arith.divf %84, %85 : vector<1x128xf32>
    %87 = vector.extract_strided_slice %75 {offsets = [0, 128], sizes = [1, 128], strides = [1, 1]} : vector<1x384xf32> to vector<1x128xf32>
    %88 = vector.extract_strided_slice %78 {offsets = [0, 128], sizes = [1, 128], strides = [1, 1]} : vector<1x384xf32> to vector<1x128xf32>
    %89 = arith.addf %87, %88 : vector<1x128xf32>
    %90 = arith.negf %89 : vector<1x128xf32>
    %91 = math.exp %90 : vector<1x128xf32>
    %cst_32 = arith.constant 1.000000e+00 : f32
    %92 = vector.broadcast %cst_32 : f32 to vector<1x128xf32>
    %93 = arith.addf %92, %91 : vector<1x128xf32>
    %94 = arith.divf %92, %93 : vector<1x128xf32>
    %95 = vector.extract_strided_slice %75 {offsets = [0, 256], sizes = [1, 128], strides = [1, 1]} : vector<1x384xf32> to vector<1x128xf32>
    %96 = vector.extract_strided_slice %78 {offsets = [0, 256], sizes = [1, 128], strides = [1, 1]} : vector<1x384xf32> to vector<1x128xf32>
    %c0_33 = arith.constant 0 : index
    %c0_34 = arith.constant 0 : index
    %97 = vector.load %arg6[%c0_33, %c0_34] : memref<1x128xf32, #tpu.memory_space<vmem>>, vector<1x128xf32>
    %98 = arith.addf %96, %97 : vector<1x128xf32>
    %99 = arith.mulf %86, %98 : vector<1x128xf32>
    %100 = arith.addf %95, %99 : vector<1x128xf32>
    %101 = math.tanh %100 : vector<1x128xf32>
    %cst_35 = arith.constant 1.000000e+00 : f32
    %102 = vector.broadcast %cst_35 : f32 to vector<1x128xf32>
    %103 = arith.subf %102, %94 : vector<1x128xf32>
    %104 = arith.mulf %103, %101 : vector<1x128xf32>
    %105 = arith.mulf %94, %73 : vector<1x128xf32>
    %106 = arith.addf %104, %105 : vector<1x128xf32>
    %c3_i32 = arith.constant 3 : i32
    %107 = arith.index_cast %c3_i32 : i32 to index
    %c0_36 = arith.constant 0 : index
    %108 = vector.load %arg8[%107, %c0_36] : memref<8x384xf32, #tpu.memory_space<vmem>>, vector<1x384xf32>
    %109 = arith.truncf %106 : vector<1x128xf32> to vector<1x128xbf16>
    %c0_37 = arith.constant 0 : index
    %c0_38 = arith.constant 0 : index
    %110 = vector.load %arg4[%c0_37, %c0_38] : memref<128x384xbf16, #tpu.memory_space<vmem>>, vector<128x384xbf16>
    %cst_39 = arith.constant dense<0.000000e+00> : vector<1x384xf32>
    %111 = tpu.matmul %109, %110, %cst_39 {dimension_numbers = #tpu.dot_dimension_numbers<[1], [0], [0], [1], [0, 0, 1, 1], [], []>} : vector<1x128xbf16>, vector<128x384xbf16>, vector<1x384xf32> -> vector<1x384xf32>
    %112 = vector.extract_strided_slice %108 {offsets = [0, 0], sizes = [1, 128], strides = [1, 1]} : vector<1x384xf32> to vector<1x128xf32>
    %113 = vector.extract_strided_slice %111 {offsets = [0, 0], sizes = [1, 128], strides = [1, 1]} : vector<1x384xf32> to vector<1x128xf32>
    %114 = arith.addf %112, %113 : vector<1x128xf32>
    %115 = arith.negf %114 : vector<1x128xf32>
    %116 = math.exp %115 : vector<1x128xf32>
    %cst_40 = arith.constant 1.000000e+00 : f32
    %117 = vector.broadcast %cst_40 : f32 to vector<1x128xf32>
    %118 = arith.addf %117, %116 : vector<1x128xf32>
    %119 = arith.divf %117, %118 : vector<1x128xf32>
    %120 = vector.extract_strided_slice %108 {offsets = [0, 128], sizes = [1, 128], strides = [1, 1]} : vector<1x384xf32> to vector<1x128xf32>
    %121 = vector.extract_strided_slice %111 {offsets = [0, 128], sizes = [1, 128], strides = [1, 1]} : vector<1x384xf32> to vector<1x128xf32>
    %122 = arith.addf %120, %121 : vector<1x128xf32>
    %123 = arith.negf %122 : vector<1x128xf32>
    %124 = math.exp %123 : vector<1x128xf32>
    %cst_41 = arith.constant 1.000000e+00 : f32
    %125 = vector.broadcast %cst_41 : f32 to vector<1x128xf32>
    %126 = arith.addf %125, %124 : vector<1x128xf32>
    %127 = arith.divf %125, %126 : vector<1x128xf32>
    %128 = vector.extract_strided_slice %108 {offsets = [0, 256], sizes = [1, 128], strides = [1, 1]} : vector<1x384xf32> to vector<1x128xf32>
    %129 = vector.extract_strided_slice %111 {offsets = [0, 256], sizes = [1, 128], strides = [1, 1]} : vector<1x384xf32> to vector<1x128xf32>
    %c0_42 = arith.constant 0 : index
    %c0_43 = arith.constant 0 : index
    %130 = vector.load %arg6[%c0_42, %c0_43] : memref<1x128xf32, #tpu.memory_space<vmem>>, vector<1x128xf32>
    %131 = arith.addf %129, %130 : vector<1x128xf32>
    %132 = arith.mulf %119, %131 : vector<1x128xf32>
    %133 = arith.addf %128, %132 : vector<1x128xf32>
    %134 = math.tanh %133 : vector<1x128xf32>
    %cst_44 = arith.constant 1.000000e+00 : f32
    %135 = vector.broadcast %cst_44 : f32 to vector<1x128xf32>
    %136 = arith.subf %135, %127 : vector<1x128xf32>
    %137 = arith.mulf %136, %134 : vector<1x128xf32>
    %138 = arith.mulf %127, %106 : vector<1x128xf32>
    %139 = arith.addf %137, %138 : vector<1x128xf32>
    %c4_i32 = arith.constant 4 : i32
    %140 = arith.index_cast %c4_i32 : i32 to index
    %c0_45 = arith.constant 0 : index
    %141 = vector.load %arg8[%140, %c0_45] : memref<8x384xf32, #tpu.memory_space<vmem>>, vector<1x384xf32>
    %142 = arith.truncf %139 : vector<1x128xf32> to vector<1x128xbf16>
    %c0_46 = arith.constant 0 : index
    %c0_47 = arith.constant 0 : index
    %143 = vector.load %arg4[%c0_46, %c0_47] : memref<128x384xbf16, #tpu.memory_space<vmem>>, vector<128x384xbf16>
    %cst_48 = arith.constant dense<0.000000e+00> : vector<1x384xf32>
    %144 = tpu.matmul %142, %143, %cst_48 {dimension_numbers = #tpu.dot_dimension_numbers<[1], [0], [0], [1], [0, 0, 1, 1], [], []>} : vector<1x128xbf16>, vector<128x384xbf16>, vector<1x384xf32> -> vector<1x384xf32>
    %145 = vector.extract_strided_slice %141 {offsets = [0, 0], sizes = [1, 128], strides = [1, 1]} : vector<1x384xf32> to vector<1x128xf32>
    %146 = vector.extract_strided_slice %144 {offsets = [0, 0], sizes = [1, 128], strides = [1, 1]} : vector<1x384xf32> to vector<1x128xf32>
    %147 = arith.addf %145, %146 : vector<1x128xf32>
    %148 = arith.negf %147 : vector<1x128xf32>
    %149 = math.exp %148 : vector<1x128xf32>
    %cst_49 = arith.constant 1.000000e+00 : f32
    %150 = vector.broadcast %cst_49 : f32 to vector<1x128xf32>
    %151 = arith.addf %150, %149 : vector<1x128xf32>
    %152 = arith.divf %150, %151 : vector<1x128xf32>
    %153 = vector.extract_strided_slice %141 {offsets = [0, 128], sizes = [1, 128], strides = [1, 1]} : vector<1x384xf32> to vector<1x128xf32>
    %154 = vector.extract_strided_slice %144 {offsets = [0, 128], sizes = [1, 128], strides = [1, 1]} : vector<1x384xf32> to vector<1x128xf32>
    %155 = arith.addf %153, %154 : vector<1x128xf32>
    %156 = arith.negf %155 : vector<1x128xf32>
    %157 = math.exp %156 : vector<1x128xf32>
    %cst_50 = arith.constant 1.000000e+00 : f32
    %158 = vector.broadcast %cst_50 : f32 to vector<1x128xf32>
    %159 = arith.addf %158, %157 : vector<1x128xf32>
    %160 = arith.divf %158, %159 : vector<1x128xf32>
    %161 = vector.extract_strided_slice %141 {offsets = [0, 256], sizes = [1, 128], strides = [1, 1]} : vector<1x384xf32> to vector<1x128xf32>
    %162 = vector.extract_strided_slice %144 {offsets = [0, 256], sizes = [1, 128], strides = [1, 1]} : vector<1x384xf32> to vector<1x128xf32>
    %c0_51 = arith.constant 0 : index
    %c0_52 = arith.constant 0 : index
    %163 = vector.load %arg6[%c0_51, %c0_52] : memref<1x128xf32, #tpu.memory_space<vmem>>, vector<1x128xf32>
    %164 = arith.addf %162, %163 : vector<1x128xf32>
    %165 = arith.mulf %152, %164 : vector<1x128xf32>
    %166 = arith.addf %161, %165 : vector<1x128xf32>
    %167 = math.tanh %166 : vector<1x128xf32>
    %cst_53 = arith.constant 1.000000e+00 : f32
    %168 = vector.broadcast %cst_53 : f32 to vector<1x128xf32>
    %169 = arith.subf %168, %160 : vector<1x128xf32>
    %170 = arith.mulf %169, %167 : vector<1x128xf32>
    %171 = arith.mulf %160, %139 : vector<1x128xf32>
    %172 = arith.addf %170, %171 : vector<1x128xf32>
    %c5_i32 = arith.constant 5 : i32
    %173 = arith.index_cast %c5_i32 : i32 to index
    %c0_54 = arith.constant 0 : index
    %174 = vector.load %arg8[%173, %c0_54] : memref<8x384xf32, #tpu.memory_space<vmem>>, vector<1x384xf32>
    %175 = arith.truncf %172 : vector<1x128xf32> to vector<1x128xbf16>
    %c0_55 = arith.constant 0 : index
    %c0_56 = arith.constant 0 : index
    %176 = vector.load %arg4[%c0_55, %c0_56] : memref<128x384xbf16, #tpu.memory_space<vmem>>, vector<128x384xbf16>
    %cst_57 = arith.constant dense<0.000000e+00> : vector<1x384xf32>
    %177 = tpu.matmul %175, %176, %cst_57 {dimension_numbers = #tpu.dot_dimension_numbers<[1], [0], [0], [1], [0, 0, 1, 1], [], []>} : vector<1x128xbf16>, vector<128x384xbf16>, vector<1x384xf32> -> vector<1x384xf32>
    %178 = vector.extract_strided_slice %174 {offsets = [0, 0], sizes = [1, 128], strides = [1, 1]} : vector<1x384xf32> to vector<1x128xf32>
    %179 = vector.extract_strided_slice %177 {offsets = [0, 0], sizes = [1, 128], strides = [1, 1]} : vector<1x384xf32> to vector<1x128xf32>
    %180 = arith.addf %178, %179 : vector<1x128xf32>
    %181 = arith.negf %180 : vector<1x128xf32>
    %182 = math.exp %181 : vector<1x128xf32>
    %cst_58 = arith.constant 1.000000e+00 : f32
    %183 = vector.broadcast %cst_58 : f32 to vector<1x128xf32>
    %184 = arith.addf %183, %182 : vector<1x128xf32>
    %185 = arith.divf %183, %184 : vector<1x128xf32>
    %186 = vector.extract_strided_slice %174 {offsets = [0, 128], sizes = [1, 128], strides = [1, 1]} : vector<1x384xf32> to vector<1x128xf32>
    %187 = vector.extract_strided_slice %177 {offsets = [0, 128], sizes = [1, 128], strides = [1, 1]} : vector<1x384xf32> to vector<1x128xf32>
    %188 = arith.addf %186, %187 : vector<1x128xf32>
    %189 = arith.negf %188 : vector<1x128xf32>
    %190 = math.exp %189 : vector<1x128xf32>
    %cst_59 = arith.constant 1.000000e+00 : f32
    %191 = vector.broadcast %cst_59 : f32 to vector<1x128xf32>
    %192 = arith.addf %191, %190 : vector<1x128xf32>
    %193 = arith.divf %191, %192 : vector<1x128xf32>
    %194 = vector.extract_strided_slice %174 {offsets = [0, 256], sizes = [1, 128], strides = [1, 1]} : vector<1x384xf32> to vector<1x128xf32>
    %195 = vector.extract_strided_slice %177 {offsets = [0, 256], sizes = [1, 128], strides = [1, 1]} : vector<1x384xf32> to vector<1x128xf32>
    %c0_60 = arith.constant 0 : index
    %c0_61 = arith.constant 0 : index
    %196 = vector.load %arg6[%c0_60, %c0_61] : memref<1x128xf32, #tpu.memory_space<vmem>>, vector<1x128xf32>
    %197 = arith.addf %195, %196 : vector<1x128xf32>
    %198 = arith.mulf %185, %197 : vector<1x128xf32>
    %199 = arith.addf %194, %198 : vector<1x128xf32>
    %200 = math.tanh %199 : vector<1x128xf32>
    %cst_62 = arith.constant 1.000000e+00 : f32
    %201 = vector.broadcast %cst_62 : f32 to vector<1x128xf32>
    %202 = arith.subf %201, %193 : vector<1x128xf32>
    %203 = arith.mulf %202, %200 : vector<1x128xf32>
    %204 = arith.mulf %193, %172 : vector<1x128xf32>
    %205 = arith.addf %203, %204 : vector<1x128xf32>
    %c6_i32 = arith.constant 6 : i32
    %206 = arith.index_cast %c6_i32 : i32 to index
    %c0_63 = arith.constant 0 : index
    %207 = vector.load %arg8[%206, %c0_63] : memref<8x384xf32, #tpu.memory_space<vmem>>, vector<1x384xf32>
    %208 = arith.truncf %205 : vector<1x128xf32> to vector<1x128xbf16>
    %c0_64 = arith.constant 0 : index
    %c0_65 = arith.constant 0 : index
    %209 = vector.load %arg4[%c0_64, %c0_65] : memref<128x384xbf16, #tpu.memory_space<vmem>>, vector<128x384xbf16>
    %cst_66 = arith.constant dense<0.000000e+00> : vector<1x384xf32>
    %210 = tpu.matmul %208, %209, %cst_66 {dimension_numbers = #tpu.dot_dimension_numbers<[1], [0], [0], [1], [0, 0, 1, 1], [], []>} : vector<1x128xbf16>, vector<128x384xbf16>, vector<1x384xf32> -> vector<1x384xf32>
    %211 = vector.extract_strided_slice %207 {offsets = [0, 0], sizes = [1, 128], strides = [1, 1]} : vector<1x384xf32> to vector<1x128xf32>
    %212 = vector.extract_strided_slice %210 {offsets = [0, 0], sizes = [1, 128], strides = [1, 1]} : vector<1x384xf32> to vector<1x128xf32>
    %213 = arith.addf %211, %212 : vector<1x128xf32>
    %214 = arith.negf %213 : vector<1x128xf32>
    %215 = math.exp %214 : vector<1x128xf32>
    %cst_67 = arith.constant 1.000000e+00 : f32
    %216 = vector.broadcast %cst_67 : f32 to vector<1x128xf32>
    %217 = arith.addf %216, %215 : vector<1x128xf32>
    %218 = arith.divf %216, %217 : vector<1x128xf32>
    %219 = vector.extract_strided_slice %207 {offsets = [0, 128], sizes = [1, 128], strides = [1, 1]} : vector<1x384xf32> to vector<1x128xf32>
    %220 = vector.extract_strided_slice %210 {offsets = [0, 128], sizes = [1, 128], strides = [1, 1]} : vector<1x384xf32> to vector<1x128xf32>
    %221 = arith.addf %219, %220 : vector<1x128xf32>
    %222 = arith.negf %221 : vector<1x128xf32>
    %223 = math.exp %222 : vector<1x128xf32>
    %cst_68 = arith.constant 1.000000e+00 : f32
    %224 = vector.broadcast %cst_68 : f32 to vector<1x128xf32>
    %225 = arith.addf %224, %223 : vector<1x128xf32>
    %226 = arith.divf %224, %225 : vector<1x128xf32>
    %227 = vector.extract_strided_slice %207 {offsets = [0, 256], sizes = [1, 128], strides = [1, 1]} : vector<1x384xf32> to vector<1x128xf32>
    %228 = vector.extract_strided_slice %210 {offsets = [0, 256], sizes = [1, 128], strides = [1, 1]} : vector<1x384xf32> to vector<1x128xf32>
    %c0_69 = arith.constant 0 : index
    %c0_70 = arith.constant 0 : index
    %229 = vector.load %arg6[%c0_69, %c0_70] : memref<1x128xf32, #tpu.memory_space<vmem>>, vector<1x128xf32>
    %230 = arith.addf %228, %229 : vector<1x128xf32>
    %231 = arith.mulf %218, %230 : vector<1x128xf32>
    %232 = arith.addf %227, %231 : vector<1x128xf32>
    %233 = math.tanh %232 : vector<1x128xf32>
    %cst_71 = arith.constant 1.000000e+00 : f32
    %234 = vector.broadcast %cst_71 : f32 to vector<1x128xf32>
    %235 = arith.subf %234, %226 : vector<1x128xf32>
    %236 = arith.mulf %235, %233 : vector<1x128xf32>
    %237 = arith.mulf %226, %205 : vector<1x128xf32>
    %238 = arith.addf %236, %237 : vector<1x128xf32>
    %c7_i32 = arith.constant 7 : i32
    %239 = arith.index_cast %c7_i32 : i32 to index
    %c0_72 = arith.constant 0 : index
    %240 = vector.load %arg8[%239, %c0_72] : memref<8x384xf32, #tpu.memory_space<vmem>>, vector<1x384xf32>
    %241 = arith.truncf %238 : vector<1x128xf32> to vector<1x128xbf16>
    %c0_73 = arith.constant 0 : index
    %c0_74 = arith.constant 0 : index
    %242 = vector.load %arg4[%c0_73, %c0_74] : memref<128x384xbf16, #tpu.memory_space<vmem>>, vector<128x384xbf16>
    %cst_75 = arith.constant dense<0.000000e+00> : vector<1x384xf32>
    %243 = tpu.matmul %241, %242, %cst_75 {dimension_numbers = #tpu.dot_dimension_numbers<[1], [0], [0], [1], [0, 0, 1, 1], [], []>} : vector<1x128xbf16>, vector<128x384xbf16>, vector<1x384xf32> -> vector<1x384xf32>
    %244 = vector.extract_strided_slice %240 {offsets = [0, 0], sizes = [1, 128], strides = [1, 1]} : vector<1x384xf32> to vector<1x128xf32>
    %245 = vector.extract_strided_slice %243 {offsets = [0, 0], sizes = [1, 128], strides = [1, 1]} : vector<1x384xf32> to vector<1x128xf32>
    %246 = arith.addf %244, %245 : vector<1x128xf32>
    %247 = arith.negf %246 : vector<1x128xf32>
    %248 = math.exp %247 : vector<1x128xf32>
    %cst_76 = arith.constant 1.000000e+00 : f32
    %249 = vector.broadcast %cst_76 : f32 to vector<1x128xf32>
    %250 = arith.addf %249, %248 : vector<1x128xf32>
    %251 = arith.divf %249, %250 : vector<1x128xf32>
    %252 = vector.extract_strided_slice %240 {offsets = [0, 128], sizes = [1, 128], strides = [1, 1]} : vector<1x384xf32> to vector<1x128xf32>
    %253 = vector.extract_strided_slice %243 {offsets = [0, 128], sizes = [1, 128], strides = [1, 1]} : vector<1x384xf32> to vector<1x128xf32>
    %254 = arith.addf %252, %253 : vector<1x128xf32>
    %255 = arith.negf %254 : vector<1x128xf32>
    %256 = math.exp %255 : vector<1x128xf32>
    %cst_77 = arith.constant 1.000000e+00 : f32
    %257 = vector.broadcast %cst_77 : f32 to vector<1x128xf32>
    %258 = arith.addf %257, %256 : vector<1x128xf32>
    %259 = arith.divf %257, %258 : vector<1x128xf32>
    %260 = vector.extract_strided_slice %240 {offsets = [0, 256], sizes = [1, 128], strides = [1, 1]} : vector<1x384xf32> to vector<1x128xf32>
    %261 = vector.extract_strided_slice %243 {offsets = [0, 256], sizes = [1, 128], strides = [1, 1]} : vector<1x384xf32> to vector<1x128xf32>
    %c0_78 = arith.constant 0 : index
    %c0_79 = arith.constant 0 : index
    %262 = vector.load %arg6[%c0_78, %c0_79] : memref<1x128xf32, #tpu.memory_space<vmem>>, vector<1x128xf32>
    %263 = arith.addf %261, %262 : vector<1x128xf32>
    %264 = arith.mulf %251, %263 : vector<1x128xf32>
    %265 = arith.addf %260, %264 : vector<1x128xf32>
    %266 = math.tanh %265 : vector<1x128xf32>
    %cst_80 = arith.constant 1.000000e+00 : f32
    %267 = vector.broadcast %cst_80 : f32 to vector<1x128xf32>
    %268 = arith.subf %267, %259 : vector<1x128xf32>
    %269 = arith.mulf %268, %266 : vector<1x128xf32>
    %270 = arith.mulf %259, %238 : vector<1x128xf32>
    %271 = arith.addf %269, %270 : vector<1x128xf32>
    %c8_i32 = arith.constant 8 : i32
    %c0_81 = arith.constant 0 : index
    %c0_82 = arith.constant 0 : index
    %272 = vector.load %arg7[%c0_81, %c0_82] : memref<1x128xf32, #tpu.memory_space<vmem>>, vector<1x128xf32>
    tpu.vector_store %arg7[%c0_81, %c0_82], %271 {strides = array<i32>} : memref<1x128xf32, #tpu.memory_space<vmem>>, vector<1x128xf32>,
    return
  }
  func.func @transform_0(%arg0: i32) -> (i32, i32) {
    %c0_i32 = arith.constant 0 : i32
    %c0_i32_0 = arith.constant 0 : i32
    %c0_i32_1 = arith.constant 0 : i32
    return %c0_i32, %c0_i32_0 : i32, i32
  }
  func.func @transform_1(%arg0: i32) -> (i32, i32) {
    %c0_i32 = arith.constant 0 : i32
    %c0_i32_0 = arith.constant 0 : i32
    %c0_i32_1 = arith.constant 0 : i32
    return %c0_i32, %c0_i32_0 : i32, i32
  }
  func.func @transform_2(%arg0: i32) -> (i32, i32) {
    %c0_i32 = arith.constant 0 : i32
    %c0_i32_0 = arith.constant 0 : i32
    %c0_i32_1 = arith.constant 0 : i32
    return %c0_i32, %c0_i32_0 : i32, i32
  }
  func.func @transform_3(%arg0: i32) -> (i32, i32) {
    %c0_i32 = arith.constant 0 : i32
    %c0_i32_0 = arith.constant 0 : i32
    %c0_i32_1 = arith.constant 0 : i32
    return %c0_i32, %c0_i32_0 : i32, i32
  }
  func.func @transform_4(%arg0: i32) -> (i32, i32) {
    %c0_i32 = arith.constant 0 : i32
    %c0_i32_0 = arith.constant 0 : i32
    %c0_i32_1 = arith.constant 0 : i32
    return %c0_i32, %c0_i32_0 : i32, i32
  }
  func.func @transform_5(%arg0: i32) -> (i32, i32) {
    %c0_i32 = arith.constant 0 : i32
    %c0_i32_0 = arith.constant 0 : i32
    %c0_i32_1 = arith.constant 0 : i32
    return %c0_i32, %c0_i32_0 : i32, i32
  }
  func.func @transform_6(%arg0: i32) -> (i32, i32) {
    %c0_i32 = arith.constant 0 : i32
    %c0_i32_0 = arith.constant 0 : i32
    %c0_i32_1 = arith.constant 0 : i32
    return %c0_i32, %c0_i32_0 : i32, i32
  }
}

</mosaic_0001>

<bundles_post_ra>
// kernel: tpu_custom_call.1
= control target key start
LH: loop header
LB: loop body
LE: loop exit
PB: predicated region body
PF: predicated region fallthrough
CT: control target
= control target key end

     0   :  { %11 = vsyncpa [#allocation4], 0  ;;  %s2455_s0 = inlined_call_operand.hbm [shape: bf16[8,128], index: 0, kind: input, shape index: {}]   ;;  %s2456_s1 = inlined_call_operand.vmem [shape: f32[1,128], index: 1, kind: input, shape index: {}]   ;;  %s2457_s2 = inlined_call_operand.hbm [shape: bf16[128,384], index: 2, kind: input, shape index: {}]   ;;  %s2458_s3 = inlined_call_operand.hbm [shape: bf16[128,384], index: 3, kind: input, shape index: {}]   ;;  %s2459_s4 = inlined_call_operand.vmem [shape: f32[1,384], index: 4, kind: input, shape index: {}]   ;;  %s2460_s5 = inlined_call_operand.vmem [shape: f32[1,128], index: 5, kind: input, shape index: {}]   ;;  %s2461_s6 = inlined_call_operand.hbm [shape: f32[1,128], index: 6, kind: output, shape index: {}]  }
   0x1   :  { %12 = vsyncpa [#allocation7], 0 }
   0x2   :  { %13 = vsyncpa [#allocation5], 0  ;;  %s1970_s21 = smov [#allocation6]   ;;  %s1876_s25 = scalar_lea.hbm %s2457_s2, 3072 }
   0x3   :  { %s31_s22 = sshll.u32 %s1970_s21, 4  ;;  %p1877_p0 = scmp.ne.s32.totalorder %s2457_s2, %s1876_s25  ;;  %s32_s22 = int_to_ptr.vmem [resolvable:$true] %s31_s22 }
   0x4   :  { %p1880_p1 = scmp.lt.u32.totalorder %s1876_s25, %s2457_s2 }
   0x6   :  { %p1882_p2 = pnand %p1880_p1, %p1877_p0 }
   0x8   :  { %1885 = shalt.err (!%p1882_p2)
}
   0x9   :  { %s1886_s30 = scalar_lea.vmem %s32_s22, 3072  ;;  %p1891_p4 = scmp.lt.s32.totalorder %s32_s22, %s32_s22 }
   0xa   :  { %p1887_p3 = scmp.ne.s32.totalorder %s32_s22, %s1886_s30  ;;  %p1892_p5 = scmp.lt.s32.totalorder %s1886_s30, %s1886_s30 }
   0xc   :  { %p1893_p6 = por %p1892_p5, %p1891_p4 }
   0xe   :  { %p1894_p7 = pnand %p1893_p6, %p1887_p3 }
  0x10   :  { %1897 = shalt.err (!%p1894_p7)
}
  0x11   :  { %s1971_s7 = smov 192   ;;  %s1972_s8 = smov 12  }
  0x12   :  { %37 = dma.hbm_to_vmem [thread:$0]  %s2457_s2, 3072, %s32_s22, [#allocation7], %s1971_s7, %s1971_s7, %s1972_s8  }
  0x13   :  { %s1973_s11 = smov [#allocation3]   ;;  %s1974_s13 = smov [#allocation8]  }
  0x14   :  { %s20_s12 = sshll.u32 %s1973_s11, 4  ;;  %s43_s14 = sshll.u32 %s1974_s13, 4  ;;  %s21_s12 = int_to_ptr.vmem [resolvable:$true] %s20_s12  ;;  %s44_s14 = int_to_ptr.vmem [resolvable:$true] %s43_s14 }
  0x15   :  { %s1898_s17 = scalar_lea.hbm %s2455_s0, 64 }
  0x16   :  { %p1899_p8 = scmp.ne.s32.totalorder %s2455_s0, %s1898_s17  ;;  %p1902_p9 = scmp.lt.u32.totalorder %s1898_s17, %s2455_s0 }
  0x18   :  { %p1904_p10 = pnand %p1902_p9, %p1899_p8 }
  0x1a   :  { %1907 = shalt.err (!%p1904_p10)
}
  0x1b   :  { %s1908_s2 = scalar_lea.vmem %s21_s12, 64  ;;  %p1913_p12 = scmp.lt.s32.totalorder %s21_s12, %s21_s12 }
  0x1c   :  { %p1909_p11 = scmp.ne.s32.totalorder %s21_s12, %s1908_s2  ;;  %p1914_p13 = scmp.lt.s32.totalorder %s1908_s2, %s1908_s2 }
  0x1e   :  { %p1915_p0 = por %p1914_p13, %p1913_p12 }
  0x20   :  { %p1916_p1 = pnand %p1915_p0, %p1909_p11 }
  0x22   :  { %1919 = shalt.err (!%p1916_p1)
}
  0x23   :  { %23 = dma.hbm_to_vmem [thread:$0]  %s2455_s0, 64, %s21_s12, [#allocation4]  }
  0x24   :  { %s1920_s26 = scalar_lea.hbm %s2458_s3, 3072 }
  0x25   :  { %p1921_p2 = scmp.ne.s32.totalorder %s2458_s3, %s1920_s26  ;;  %p1924_p3 = scmp.lt.u32.totalorder %s1920_s26, %s2458_s3 }
  0x27   :  { %p1926_p4 = pnand %p1924_p3, %p1921_p2 }
  0x29   :  { %1929 = shalt.err (!%p1926_p4)
}
  0x2a   :  { %s1930_s9 = scalar_lea.vmem %s44_s14, 3072  ;;  %p1935_p6 = scmp.lt.s32.totalorder %s44_s14, %s44_s14 }
  0x2b   :  { %p1931_p5 = scmp.ne.s32.totalorder %s44_s14, %s1930_s9  ;;  %p1936_p7 = scmp.lt.s32.totalorder %s1930_s9, %s1930_s9 }
  0x2d   :  { %p1937_p8 = por %p1936_p7, %p1935_p6 }
  0x2f   :  { %p1938_p9 = pnand %p1937_p8, %p1931_p5 }
  0x31   :  { %1941 = shalt.err (!%p1938_p9)
}
  0x32   :  { %49 = dma.hbm_to_vmem [thread:$0]  %s2458_s3, 3072, %s44_s14, [#allocation7], %s1971_s7, %s1971_s7, %s1972_s8  }
  0x33   :  { %1964 = dma.done.wait [#allocation4], 64  }
  0x34   :  { %1965 = vsyncadd [#allocation4], 4294967232 }
  0x35   :  { %1966 = dma.done.wait [#allocation7], 6144  }
  0x36   :  { %1967 = vsyncadd [#allocation7], 4294961152  ;;  %v1975_v0 = vmov 0.0   ;;  %v1976_v1 = vmov 0   ;;  %vm1977_vm0 = vmmov 0   ;;  %v99_v53 = vlaneseq }
  0x37   :  { %1537 = vmatprep.subr.bf16.mxu1 %v1975_v0  ;;  %274 = vmatprep.mubr.bf16.mxu0 %v1976_v1  ;;  %v1726_v2 = vld [vmem:[#allocation6 + $0x4] ss:$12 sps:$4 sm:$0xff]   ;;  %v1728_v3 = vld [vmem:[#allocation6] ss:$12 sps:$4 sm:$0xff]   ;;  %v1729_v4 = vld [vmem:[#allocation6 + $0x8] ss:$12 sps:$4 sm:$0xff]  }
  0x38   :  { %1553 = vmatprep.mubr.msk.bf16.mxu1 %vm1977_vm0, %v1975_v0  ;;  %242 = vmatprep.subr.bf16.mxu0 %v1726_v2  ;;  %v1730_v5 = vld [vmem:[#allocation6 + $0x1c] ss:$12 sps:$4 sm:$0xff]   ;;  %v1732_v6 = vld [vmem:[#allocation6 + $0x18] ss:$12 sps:$4 sm:$0xff]   ;;  %v1733_v7 = vld [vmem:[#allocation6 + $0x20] ss:$12 sps:$4 sm:$0xff]  }
  0x39   :  { %243 = vmatpush1.bf16.msra.mxu0 %v1728_v3  ;;  %1538 = vmatpush3.bf16.msra.mxu1 %v1729_v4  ;;  %v1734_v8 = vld [vmem:[#allocation6 + $0x34] ss:$12 sps:$4 sm:$0xff]   ;;  %v1736_v9 = vld [vmem:[#allocation6 + $0x30] ss:$12 sps:$4 sm:$0xff]   ;;  %v1737_v10 = vld [vmem:[#allocation6 + $0x38] ss:$12 sps:$4 sm:$0xff]  }
  0x3a   :  { %244 = vmatprep.subr.bf16.mxu0 %v1730_v5  ;;  %1539 = vmatprep.subr.bf16.mxu1 %v1975_v0  ;;  %v1738_v11 = vld [vmem:[#allocation6 + $0x4c] ss:$12 sps:$4 sm:$0xff]   ;;  %v1740_v12 = vld [vmem:[#allocation6 + $0x48] ss:$12 sps:$4 sm:$0xff]   ;;  %v1741_v13 = vld [vmem:[#allocation6 + $0x50] ss:$12 sps:$4 sm:$0xff]  }
  0x3b   :  { %v1742_v14 = vld [vmem:[#allocation6 + $0x64] ss:$12 sps:$4 sm:$0xff]   ;;  %v1744_v15 = vld [vmem:[#allocation6 + $0x60] ss:$12 sps:$4 sm:$0xff]   ;;  %v1745_v16 = vld [vmem:[#allocation6 + $0x68] ss:$12 sps:$4 sm:$0xff]  }
  0x3c   :  { %v1746_v17 = vld [vmem:[#allocation6 + $0x7c] ss:$12 sps:$4 sm:$0xff]   ;;  %v1748_v18 = vld [vmem:[#allocation6 + $0x78] ss:$12 sps:$4 sm:$0xff]   ;;  %v1749_v19 = vld [vmem:[#allocation6 + $0x80] ss:$12 sps:$4 sm:$0xff]  }
  0x3d   :  { %245 = vmatpush1.bf16.msra.mxu0 %v1732_v6  ;;  %1540 = vmatpush3.bf16.msra.mxu1 %v1733_v7  ;;  %v1750_v20 = vld [vmem:[#allocation6 + $0x94] ss:$12 sps:$4 sm:$0xff]   ;;  %v1752_v21 = vld [vmem:[#allocation6 + $0x90] ss:$12 sps:$4 sm:$0xff]   ;;  %v1753_v22 = vld [vmem:[#allocation6 + $0x98] ss:$12 sps:$4 sm:$0xff]  }
  0x3e   :  { %246 = vmatprep.subr.bf16.mxu0 %v1734_v8  ;;  %1541 = vmatprep.subr.bf16.mxu1 %v1975_v0  ;;  %v1754_v23 = vld [vmem:[#allocation6 + $0xac] ss:$12 sps:$4 sm:$0xff]   ;;  %v1756_v24 = vld [vmem:[#allocation6 + $0xa8] ss:$12 sps:$4 sm:$0xff]   ;;  %v1757_v25 = vld [vmem:[#allocation6 + $0xb0] ss:$12 sps:$4 sm:$0xff]  }
  0x3f   :  { %v2066_v26 = vld [vmem:[#allocation8 + $0x4] ss:$12 sps:$4 sm:$0xff]   ;;  %v64_v27 = vld [vmem:[#allocation3] sm:$0xf]  ;;  %v2069_v28 = vld [vmem:[#allocation8] ss:$12 sps:$4 sm:$0xff]  }
  0x40   :  { %v2071_v29 = vld [vmem:[#allocation8 + $0x1c] ss:$12 sps:$4 sm:$0xff]   ;;  %v2077_v31 = vld [vmem:[#allocation8 + $0x18] ss:$12 sps:$4 sm:$0xff]   ;;  %v2080_v32 = vld [vmem:[#allocation8 + $0x34] ss:$12 sps:$4 sm:$0xff]  }
  0x41   :  { %247 = vmatpush1.bf16.msra.mxu0 %v1736_v9  ;;  %1542 = vmatpush3.bf16.msra.mxu1 %v1737_v10  ;;  %v2074_v30 = vld [vmem:[#allocation8 + $0x8] ss:$12 sps:$4 sm:$0xff]   ;;  %v2084_v33 = vld [vmem:[#allocation8 + $0x20] ss:$12 sps:$4 sm:$0xff]   ;;  %v2091_v34 = vld [vmem:[#allocation8 + $0x30] ss:$12 sps:$4 sm:$0xff]  }
  0x42   :  { %248 = vmatprep.subr.bf16.mxu0 %v1738_v11  ;;  %1543 = vmatprep.subr.bf16.mxu1 %v1975_v0  ;;  %v2094_v35 = vld [vmem:[#allocation8 + $0x4c] ss:$12 sps:$4 sm:$0xff]   ;;  %v2101_v37 = vld [vmem:[#allocation8 + $0x48] ss:$12 sps:$4 sm:$0xff]   ;;  %v2104_v38 = vld [vmem:[#allocation8 + $0x64] ss:$12 sps:$4 sm:$0xff]  }
  0x43   :  { %v2097_v36 = vld [vmem:[#allocation8 + $0x38] ss:$12 sps:$4 sm:$0xff]   ;;  %v2107_v39 = vld [vmem:[#allocation8 + $0x50] ss:$12 sps:$4 sm:$0xff]   ;;  %v2111_v40 = vld [vmem:[#allocation8 + $0x60] ss:$12 sps:$4 sm:$0xff]  }
  0x44   :  { %v2114_v41 = vld [vmem:[#allocation8 + $0x7c] ss:$12 sps:$4 sm:$0xff]   ;;  %v2121_v43 = vld [vmem:[#allocation8 + $0x78] ss:$12 sps:$4 sm:$0xff]   ;;  %v2124_v44 = vld [vmem:[#allocation8 + $0x94] ss:$12 sps:$4 sm:$0xff]  }
  0x45   :  { %249 = vmatpush1.bf16.msra.mxu0 %v1740_v12  ;;  %1544 = vmatpush3.bf16.msra.mxu1 %v1741_v13  ;;  %v2117_v42 = vld [vmem:[#allocation8 + $0x68] ss:$12 sps:$4 sm:$0xff]   ;;  %v2127_v45 = vld [vmem:[#allocation8 + $0x80] ss:$12 sps:$4 sm:$0xff]   ;;  %v2131_v46 = vld [vmem:[#allocation8 + $0x90] ss:$12 sps:$4 sm:$0xff]  }
  0x46   :  { %250 = vmatprep.subr.bf16.mxu0 %v1742_v14  ;;  %1545 = vmatprep.subr.bf16.mxu1 %v1975_v0  ;;  %v2134_v47 = vld [vmem:[#allocation8 + $0xac] ss:$12 sps:$4 sm:$0xff]   ;;  %v2141_v49 = vld [vmem:[#allocation8 + $0xa8] ss:$12 sps:$4 sm:$0xff]   ;;  %v2146_v50 = vld [vmem:[%s2456_s1] sm:$0x1] }
  0x47   :  { %v2137_v48 = vld [vmem:[#allocation8 + $0x98] ss:$12 sps:$4 sm:$0xff]   ;;  %v2150_v51 = vld [vmem:[#allocation8 + $0xb0] ss:$12 sps:$4 sm:$0xff]   ;;  %v328_v52 = vpack.c.bf16 %v2146_v50, %v2146_v50  ;;  %v100_v54 = vshrl.u32 %v99_v53, 7 }
  0x48   :  { %v97_v56 = vld [vmem:[%s2459_s4] sm:$0x7] }
  0x49   :  { %251 = vmatpush1.bf16.msra.mxu0 %v1744_v15  ;;  %1546 = vmatpush3.bf16.msra.mxu1 %v1745_v16  ;;  %v101_v55 = vsub.s32 0, %v100_v54  ;;  %v105_v57 = vsub.s32 1, %v100_v54  ;;  %v109_v58 = vsub.s32 2, %v100_v54  ;;  %v2200_v53 = vld [vmem:[%s2460_s5] sm:$0x1]  ;;  %s1978_s5 = smov [#allocation9]  }
  0x4a   :  { %252 = vmatprep.subr.bf16.mxu0 %v1746_v17  ;;  %1547 = vmatprep.subr.bf16.mxu1 %v1975_v0  ;;  %s1382_s12 = sshll.u32 %s1978_s5, 4  ;;  %s1383_s12 = int_to_ptr.vmem [resolvable:$true] %s1382_s12 }
  0x4b   :  { %v102_v59 = vrot.slane %v97_v56, %v101_v55  ;;  %v106_v60 = vrot.slane %v97_v56, %v105_v57  ;;  %v110_v61 = vrot.slane %v97_v56, %v109_v58  ;;  %s1942_s13 = scalar_lea.vmem %s1383_s12, 16  ;;  %s1946_s14 = scalar_lea.vmem %s1383_s12, 32 }
  0x4c   :  { %p1943_p10 = scmp.ne.s32.totalorder %s1383_s12, %s1942_s13  ;;  %p1947_p11 = scmp.lt.s32.totalorder %s1383_s12, %s1383_s12 }
  0x4d   :  { %253 = vmatpush1.bf16.msra.mxu0 %v1748_v18  ;;  %1548 = vmatpush3.bf16.msra.mxu1 %v1749_v19  ;;  %p1948_p12 = scmp.lt.s32.totalorder %s1946_s14, %s1942_s13 }
  0x4e   :  { %254 = vmatprep.subr.bf16.mxu0 %v1750_v20  ;;  %1549 = vmatprep.subr.bf16.mxu1 %v1975_v0 }
  0x4f   :  { %p1949_p13 = por %p1948_p12, %p1947_p11 }
  0x51   :  { %255 = vmatpush1.bf16.msra.mxu0 %v1752_v21  ;;  %1550 = vmatpush3.bf16.msra.mxu1 %v1753_v22  ;;  %p1950_p0 = pnand %p1949_p13, %p1943_p10 }
  0x52   :  { %256 = vmatprep.subr.bf16.mxu0 %v1754_v23  ;;  %1551 = vmatprep.subr.bf16.mxu1 %v1975_v0 }
  0x55   :  { %257 = vmatpush1.bf16.msra.mxu0 %v1756_v24  ;;  %1552 = vmatpush3.bf16.msra.mxu1 %v1757_v25 }
  0x56   :  { %489 = vmatprep.subr.bf16.mxu0 %v2066_v26  ;;  %1557 = vmatprep.subr.bf16.mxu1 %v1975_v0 }
  0x58   :  { %275 = vmatmul.mubr.bf16.vlgmr.msra.gmra.mrb[0].mxu0 %v64_v27  ;;  %1554 = vmatmul.mubr.bf16.vlgmr.msra.gmra.mrb[0].mxu1 %v64_v27 }
  0x59   :  { %490 = vmatpush1.bf16.msra.mxu0 %v2069_v28  ;;  %1558 = vmatpush3.bf16.msra.mxu1 %v2074_v30 }
  0x5a   :  { %491 = vmatprep.subr.bf16.mxu0 %v2071_v29  ;;  %1559 = vmatprep.subr.bf16.mxu1 %v1975_v0 }
  0x5b   :  { %521 = vmatprep.mubr.bf16.mxu0 %v1976_v1  ;;  %1573 = vmatprep.mubr.msk.bf16.mxu1 %vm1977_vm0, %v1975_v0 }
  0x5d   :  { %492 = vmatpush1.bf16.msra.mxu0 %v2077_v31  ;;  %1560 = vmatpush3.bf16.msra.mxu1 %v2084_v33 }
  0x5e   :  { %493 = vmatprep.subr.bf16.mxu0 %v2080_v32  ;;  %1561 = vmatprep.subr.bf16.mxu1 %v1975_v0 }
  0x61   :  { %494 = vmatpush1.bf16.msra.mxu0 %v2091_v34  ;;  %1562 = vmatpush3.bf16.msra.mxu1 %v2097_v36 }
  0x62   :  { %495 = vmatprep.subr.bf16.mxu0 %v2094_v35  ;;  %1563 = vmatprep.subr.bf16.mxu1 %v1975_v0 }
  0x65   :  { %496 = vmatpush1.bf16.msra.mxu0 %v2101_v37  ;;  %1564 = vmatpush3.bf16.msra.mxu1 %v2107_v39 }
  0x66   :  { %497 = vmatprep.subr.bf16.mxu0 %v2104_v38  ;;  %1565 = vmatprep.subr.bf16.mxu1 %v1975_v0 }
  0x69   :  { %498 = vmatpush1.bf16.msra.mxu0 %v2111_v40  ;;  %1566 = vmatpush3.bf16.msra.mxu1 %v2117_v42 }
  0x6a   :  { %499 = vmatprep.subr.bf16.mxu0 %v2114_v41  ;;  %1567 = vmatprep.subr.bf16.mxu1 %v1975_v0 }
  0x6d   :  { %500 = vmatpush1.bf16.msra.mxu0 %v2121_v43  ;;  %1568 = vmatpush3.bf16.msra.mxu1 %v2127_v45 }
  0x6e   :  { %501 = vmatprep.subr.bf16.mxu0 %v2124_v44  ;;  %1569 = vmatprep.subr.bf16.mxu1 %v1975_v0 }
  0x71   :  { %502 = vmatpush1.bf16.msra.mxu0 %v2131_v46  ;;  %1570 = vmatpush3.bf16.msra.mxu1 %v2137_v48 }
  0x72   :  { %503 = vmatprep.subr.bf16.mxu0 %v2134_v47  ;;  %1571 = vmatprep.subr.bf16.mxu1 %v1975_v0 }
  0x75   :  { %504 = vmatpush1.bf16.msra.mxu0 %v2141_v49  ;;  %1572 = vmatpush3.bf16.msra.mxu1 %v2150_v51 }
  0x76   :  { %601 = vmatprep.subr.bf16.mxu0 %v2066_v26  ;;  %1577 = vmatprep.subr.bf16.mxu1 %v1975_v0 }
  0x78   :  { %522 = vmatmul.mubr.bf16.vlgmr.msra.gmra.mrb[4].mxu0 %v328_v52  ;;  %1574 = vmatmul.mubr.bf16.vlgmr.msra.gmra.mrb[4].mxu1 %v328_v52 }
  0x79   :  { %602 = vmatpush1.bf16.msra.mxu0 %v2069_v28  ;;  %1578 = vmatpush3.bf16.msra.mxu1 %v2074_v30 }
  0x7a   :  { %603 = vmatprep.subr.bf16.mxu0 %v2071_v29  ;;  %1579 = vmatprep.subr.bf16.mxu1 %v1975_v0 }
  0x7b   :  { %633 = vmatprep.mubr.bf16.mxu0 %v1976_v1  ;;  %1593 = vmatprep.mubr.msk.bf16.mxu1 %vm1977_vm0, %v1975_v0 }
  0x7d   :  { %604 = vmatpush1.bf16.msra.mxu0 %v2077_v31  ;;  %1580 = vmatpush3.bf16.msra.mxu1 %v2084_v33 }
  0x7e   :  { %605 = vmatprep.subr.bf16.mxu0 %v2080_v32  ;;  %1581 = vmatprep.subr.bf16.mxu1 %v1975_v0 }
  0x81   :  { %606 = vmatpush1.bf16.msra.mxu0 %v2091_v34  ;;  %1582 = vmatpush3.bf16.msra.mxu1 %v2097_v36 }
  0x82   :  { %607 = vmatprep.subr.bf16.mxu0 %v2094_v35  ;;  %1583 = vmatprep.subr.bf16.mxu1 %v1975_v0 }
  0x85   :  { %608 = vmatpush1.bf16.msra.mxu0 %v2101_v37  ;;  %1584 = vmatpush3.bf16.msra.mxu1 %v2107_v39 }
  0x86   :  { %609 = vmatprep.subr.bf16.mxu0 %v2104_v38  ;;  %1585 = vmatprep.subr.bf16.mxu1 %v1975_v0 }
  0x89   :  { %610 = vmatpush1.bf16.msra.mxu0 %v2111_v40  ;;  %1586 = vmatpush3.bf16.msra.mxu1 %v2117_v42 }
  0x8a   :  { %611 = vmatprep.subr.bf16.mxu0 %v2114_v41  ;;  %1587 = vmatprep.subr.bf16.mxu1 %v1975_v0 }
  0x8d   :  { %612 = vmatpush1.bf16.msra.mxu0 %v2121_v43  ;;  %1588 = vmatpush3.bf16.msra.mxu1 %v2127_v45 }
  0x8e   :  { %613 = vmatprep.subr.bf16.mxu0 %v2124_v44  ;;  %1589 = vmatprep.subr.bf16.mxu1 %v1975_v0 }
  0x91   :  { %614 = vmatpush1.bf16.msra.mxu0 %v2131_v46  ;;  %1590 = vmatpush3.bf16.msra.mxu1 %v2137_v48 }
  0x92   :  { %615 = vmatprep.subr.bf16.mxu0 %v2134_v47  ;;  %1591 = vmatprep.subr.bf16.mxu1 %v1975_v0 }
  0x95   :  { %616 = vmatpush1.bf16.msra.mxu0 %v2141_v49  ;;  %1592 = vmatpush3.bf16.msra.mxu1 %v2150_v51 }
  0x96   :  { %712 = vmatprep.subr.bf16.mxu0 %v2066_v26  ;;  %1597 = vmatprep.subr.bf16.mxu1 %v1975_v0 }
 0x12b   :  { %v276_v62 = vpop.f32.mrb[0].mxu0  ;;  %v317_v3 = vpop.f32.mrb[0].mxu1 }
 0x12c   :  { %v277_v63 = vadd.f32 %v276_v62, %v102_v59  ;;  %v278_v2 = vpop.f32.mrb[1].mxu0  ;;  %v318_v5 = vadd.f32 %v317_v3, %v110_v61  ;;  %v1555_v7 = vpop.f32.mrb[1].mxu1 }
 0x12d   :  { %v279_v4 = vadd.f32 %v278_v2, %v106_v60  ;;  %v280_v6 = vpop.f32.mrb[2].mxu0  ;;  %v320_v9 = vpop.f32.mrb[2].mxu1 }
 0x12e   :  { %323 = vst [vmem:[#allocation2] sm:$0xff] %v277_v63  ;;  %v281_v8 = vpop.f32.mrb[3].mxu0  ;;  %325 = vst [vmem:[#allocation2 + $0x10] sm:$0xff] %v318_v5  ;;  %v1556_v10 = vpop.f32.mrb[3].mxu1 }
 0x12f   :  { %324 = vst [vmem:[#allocation2 + $0x8] sm:$0xff] %v279_v4 }
 0x136   :  { %v327_v11 = vld [vmem:[#allocation2] ss:$8 sm:$0x7] }
 0x137   :  { %v578_v16 = vrot.slane %v327_v11, 1  ;;  %v590_v57 = vrot.slane %v327_v11, 2 }
 0x14b   :  { %v523_v12 = vpop.f32.mrb[4].mxu0  ;;  %v564_v15 = vpop.f32.mrb[4].mxu1 }
 0x14c   :  { %v570_v13 = vadd.f32 %v523_v12, %v327_v11  ;;  %v525_v14 = vpop.f32.mrb[5].mxu0  ;;  %v1575_v18 = vpop.f32.mrb[5].mxu1  ;;  %v588_v55 = vadd.f32 %v2200_v53, %v564_v15 }
 0x14d   :  { %v527_v17 = vpop.f32.mrb[6].mxu0  ;;  %v567_v21 = vpop.f32.mrb[6].mxu1  ;;  %v580_v22 = vadd.f32 %v578_v16, %v525_v14 }
 0x14e   :  { %v1440_v19 = vmul.f32 -1.442695, %v570_v13  ;;  %v528_v20 = vpop.f32.mrb[7].mxu0  ;;  %v1576_v23 = vpop.f32.mrb[7].mxu1 }
 0x14f   :  { %v1441_v24 = vmul.f32 -1.442695, %v580_v22 }
 0x150   :  { %1790 = vpow2.f32 %v1440_v19 }
 0x151   :  { %1792 = vpow2.f32 %v1441_v24 }
 0x15a   :  { %v1791_v25 = vpop.eup %1790 }
 0x15b   :  { %v574_v27 = vadd.f32 1.0, %v1791_v25  ;;  %v1793_v52 = vpop.eup %1792 }
 0x15c   :  { %v584_v54 = vadd.f32 1.0, %v1793_v52 }
 0x15d   :  { %1794 = vrcp.f32 %v574_v27 }
 0x15e   :  { %1796 = vrcp.f32 %v584_v54 }
 0x167   :  { %v1795_v56 = vpop.eup %1794 }
 0x168   :  { %v589_v58 = vmul.f32 %v1795_v56, %v588_v55  ;;  %v1797_v60 = vpop.eup %1796 }
 0x169   :  { %v594_v61 = vsub.f32 1.0, %v1797_v60  ;;  %v596_v2 = vmul.f32 %v1797_v60, %v2146_v50  ;;  %v599_v50 = vld [vmem:[#allocation2 + $0x1] ss:$8 sm:$0x7] }
 0x16a   :  { %v592_v59 = vadd.f32 %v590_v57, %v589_v58  ;;  %v690_v10 = vrot.slane %v599_v50, 1  ;;  %v701_v24 = vrot.slane %v599_v50, 2  ;;  %v710_v60 = vld [vmem:[#allocation2 + $0x2] ss:$8 sm:$0x7] }
 0x16c   :  { %1798 = vtanh.f32 %v592_v59 }
 0x176   :  { %v1799_v62 = vpop.eup %1798 }
 0x177   :  { %v595_v63 = vmul.f32 %v1799_v62, %v594_v61 }
 0x179   :  { %v2204_v3 = vadd.f32 %v596_v2, %v595_v63 }
 0x17b   :  { %v600_v4 = vpack.c.bf16 %v2204_v3, %v2204_v3 }
 0x17d   :  { %634 = vmatmul.mubr.bf16.vlgmr.msra.gmra.mrb[8].mxu0 %v600_v4  ;;  %1594 = vmatmul.mubr.bf16.vlgmr.msra.gmra.mrb[8].mxu1 %v600_v4  ;;  %v801_v4 = vrot.slane %v710_v60, 1 }
 0x17e   :  { %713 = vmatpush1.bf16.msra.mxu0 %v2069_v28  ;;  %1598 = vmatpush3.bf16.msra.mxu1 %v2074_v30 }
 0x17f   :  { %714 = vmatprep.subr.bf16.mxu0 %v2071_v29  ;;  %1599 = vmatprep.subr.bf16.mxu1 %v1975_v0 }
 0x180   :  { %744 = vmatprep.mubr.bf16.mxu0 %v1976_v1  ;;  %1613 = vmatprep.mubr.msk.bf16.mxu1 %vm1977_vm0, %v1975_v0 }
 0x182   :  { %715 = vmatpush1.bf16.msra.mxu0 %v2077_v31  ;;  %1600 = vmatpush3.bf16.msra.mxu1 %v2084_v33 }
 0x183   :  { %716 = vmatprep.subr.bf16.mxu0 %v2080_v32  ;;  %1601 = vmatprep.subr.bf16.mxu1 %v1975_v0 }
 0x186   :  { %717 = vmatpush1.bf16.msra.mxu0 %v2091_v34  ;;  %1602 = vmatpush3.bf16.msra.mxu1 %v2097_v36 }
 0x187   :  { %718 = vmatprep.subr.bf16.mxu0 %v2094_v35  ;;  %1603 = vmatprep.subr.bf16.mxu1 %v1975_v0 }
 0x18a   :  { %719 = vmatpush1.bf16.msra.mxu0 %v2101_v37  ;;  %1604 = vmatpush3.bf16.msra.mxu1 %v2107_v39 }
 0x18b   :  { %720 = vmatprep.subr.bf16.mxu0 %v2104_v38  ;;  %1605 = vmatprep.subr.bf16.mxu1 %v1975_v0 }
 0x18e   :  { %721 = vmatpush1.bf16.msra.mxu0 %v2111_v40  ;;  %1606 = vmatpush3.bf16.msra.mxu1 %v2117_v42 }
 0x18f   :  { %722 = vmatprep.subr.bf16.mxu0 %v2114_v41  ;;  %1607 = vmatprep.subr.bf16.mxu1 %v1975_v0 }
 0x192   :  { %723 = vmatpush1.bf16.msra.mxu0 %v2121_v43  ;;  %1608 = vmatpush3.bf16.msra.mxu1 %v2127_v45 }
 0x193   :  { %724 = vmatprep.subr.bf16.mxu0 %v2124_v44  ;;  %1609 = vmatprep.subr.bf16.mxu1 %v1975_v0 }
 0x196   :  { %725 = vmatpush1.bf16.msra.mxu0 %v2131_v46  ;;  %1610 = vmatpush3.bf16.msra.mxu1 %v2137_v48 }
 0x197   :  { %726 = vmatprep.subr.bf16.mxu0 %v2134_v47  ;;  %1611 = vmatprep.subr.bf16.mxu1 %v1975_v0 }
 0x19a   :  { %727 = vmatpush1.bf16.msra.mxu0 %v2141_v49  ;;  %1612 = vmatpush3.bf16.msra.mxu1 %v2150_v51 }
 0x19b   :  { %823 = vmatprep.subr.bf16.mxu0 %v2066_v26  ;;  %1617 = vmatprep.subr.bf16.mxu1 %v1975_v0 }
 0x250   :  { %v635_v5 = vpop.f32.mrb[8].mxu0  ;;  %v676_v6 = vpop.f32.mrb[8].mxu1 }
 0x251   :  { %v682_v7 = vadd.f32 %v635_v5, %v599_v50  ;;  %v637_v8 = vpop.f32.mrb[9].mxu0  ;;  %v1595_v9 = vpop.f32.mrb[9].mxu1  ;;  %v699_v22 = vadd.f32 %v676_v6, %v2200_v53 }
 0x252   :  { %v639_v11 = vpop.f32.mrb[10].mxu0  ;;  %v679_v12 = vpop.f32.mrb[10].mxu1  ;;  %v692_v16 = vadd.f32 %v690_v10, %v637_v8 }
 0x253   :  { %v1442_v13 = vmul.f32 -1.442695, %v682_v7  ;;  %v640_v14 = vpop.f32.mrb[11].mxu0  ;;  %v1596_v15 = vpop.f32.mrb[11].mxu1 }
 0x254   :  { %v1443_v17 = vmul.f32 -1.442695, %v692_v16 }
 0x255   :  { %1800 = vpow2.f32 %v1442_v13 }
 0x256   :  { %1802 = vpow2.f32 %v1443_v17  ;;  %v812_v17 = vrot.slane %v710_v60, 2 }
 0x25f   :  { %v1801_v18 = vpop.eup %1800 }
 0x260   :  { %v686_v19 = vadd.f32 1.0, %v1801_v18  ;;  %v1803_v20 = vpop.eup %1802 }
 0x261   :  { %v696_v21 = vadd.f32 1.0, %v1803_v20 }
 0x262   :  { %1804 = vrcp.f32 %v686_v19 }
 0x263   :  { %1806 = vrcp.f32 %v696_v21 }
 0x26c   :  { %v1805_v23 = vpop.eup %1804 }
 0x26d   :  { %v700_v25 = vmul.f32 %v1805_v23, %v699_v22  ;;  %v1807_v52 = vpop.eup %1806 }
 0x26e   :  { %v705_v54 = vsub.f32 1.0, %v1807_v52  ;;  %v707_v57 = vmul.f32 %v1807_v52, %v2204_v3  ;;  %v821_v52 = vld [vmem:[#allocation2 + $0x3] ss:$8 sm:$0x7] }
 0x26f   :  { %v703_v27 = vadd.f32 %v701_v24, %v700_v25 }
 0x271   :  { %1808 = vtanh.f32 %v703_v27 }
 0x27b   :  { %v1809_v55 = vpop.eup %1808 }
 0x27c   :  { %v706_v56 = vmul.f32 %v1809_v55, %v705_v54 }
 0x27e   :  { %v2245_v58 = vadd.f32 %v707_v57, %v706_v56 }
 0x280   :  { %v711_v59 = vpack.c.bf16 %v2245_v58, %v2245_v58 }
 0x282   :  { %745 = vmatmul.mubr.bf16.vlgmr.msra.gmra.mrb[12].mxu0 %v711_v59  ;;  %1614 = vmatmul.mubr.bf16.vlgmr.msra.gmra.mrb[12].mxu1 %v711_v59  ;;  %v912_v59 = vrot.slane %v821_v52, 1 }
 0x283   :  { %824 = vmatpush1.bf16.msra.mxu0 %v2069_v28  ;;  %1618 = vmatpush3.bf16.msra.mxu1 %v2074_v30 }
 0x284   :  { %825 = vmatprep.subr.bf16.mxu0 %v2071_v29  ;;  %1619 = vmatprep.subr.bf16.mxu1 %v1975_v0 }
 0x285   :  { %855 = vmatprep.mubr.bf16.mxu0 %v1976_v1  ;;  %1633 = vmatprep.mubr.msk.bf16.mxu1 %vm1977_vm0, %v1975_v0 }
 0x287   :  { %826 = vmatpush1.bf16.msra.mxu0 %v2077_v31  ;;  %1620 = vmatpush3.bf16.msra.mxu1 %v2084_v33 }
 0x288   :  { %827 = vmatprep.subr.bf16.mxu0 %v2080_v32  ;;  %1621 = vmatprep.subr.bf16.mxu1 %v1975_v0 }
 0x28b   :  { %828 = vmatpush1.bf16.msra.mxu0 %v2091_v34  ;;  %1622 = vmatpush3.bf16.msra.mxu1 %v2097_v36 }
 0x28c   :  { %829 = vmatprep.subr.bf16.mxu0 %v2094_v35  ;;  %1623 = vmatprep.subr.bf16.mxu1 %v1975_v0 }
 0x28f   :  { %830 = vmatpush1.bf16.msra.mxu0 %v2101_v37  ;;  %1624 = vmatpush3.bf16.msra.mxu1 %v2107_v39 }
 0x290   :  { %831 = vmatprep.subr.bf16.mxu0 %v2104_v38  ;;  %1625 = vmatprep.subr.bf16.mxu1 %v1975_v0 }
 0x293   :  { %832 = vmatpush1.bf16.msra.mxu0 %v2111_v40  ;;  %1626 = vmatpush3.bf16.msra.mxu1 %v2117_v42 }
 0x294   :  { %833 = vmatprep.subr.bf16.mxu0 %v2114_v41  ;;  %1627 = vmatprep.subr.bf16.mxu1 %v1975_v0 }
 0x297   :  { %834 = vmatpush1.bf16.msra.mxu0 %v2121_v43  ;;  %1628 = vmatpush3.bf16.msra.mxu1 %v2127_v45 }
 0x298   :  { %835 = vmatprep.subr.bf16.mxu0 %v2124_v44  ;;  %1629 = vmatprep.subr.bf16.mxu1 %v1975_v0 }
 0x29b   :  { %836 = vmatpush1.bf16.msra.mxu0 %v2131_v46  ;;  %1630 = vmatpush3.bf16.msra.mxu1 %v2137_v48 }
 0x29c   :  { %837 = vmatprep.subr.bf16.mxu0 %v2134_v47  ;;  %1631 = vmatprep.subr.bf16.mxu1 %v1975_v0 }
 0x29f   :  { %838 = vmatpush1.bf16.msra.mxu0 %v2141_v49  ;;  %1632 = vmatpush3.bf16.msra.mxu1 %v2150_v51 }
 0x2a0   :  { %934 = vmatprep.subr.bf16.mxu0 %v2066_v26  ;;  %1637 = vmatprep.subr.bf16.mxu1 %v1975_v0 }
 0x355   :  { %v746_v61 = vpop.f32.mrb[12].mxu0  ;;  %v787_v62 = vpop.f32.mrb[12].mxu1 }
 0x356   :  { %v793_v63 = vadd.f32 %v746_v61, %v710_v60  ;;  %v748_v2 = vpop.f32.mrb[13].mxu0  ;;  %v1615_v3 = vpop.f32.mrb[13].mxu1  ;;  %v810_v15 = vadd.f32 %v787_v62, %v2200_v53 }
 0x357   :  { %v750_v50 = vpop.f32.mrb[14].mxu0  ;;  %v790_v5 = vpop.f32.mrb[14].mxu1  ;;  %v803_v9 = vadd.f32 %v801_v4, %v748_v2 }
 0x358   :  { %v1444_v6 = vmul.f32 -1.442695, %v793_v63  ;;  %v751_v7 = vpop.f32.mrb[15].mxu0  ;;  %v1616_v8 = vpop.f32.mrb[15].mxu1 }
 0x359   :  { %v1445_v10 = vmul.f32 -1.442695, %v803_v9 }
 0x35a   :  { %1810 = vpow2.f32 %v1444_v6 }
 0x35b   :  { %1812 = vpow2.f32 %v1445_v10  ;;  %v923_v10 = vrot.slane %v821_v52, 2 }
 0x364   :  { %v1811_v11 = vpop.eup %1810 }
 0x365   :  { %v797_v12 = vadd.f32 1.0, %v1811_v11  ;;  %v1813_v13 = vpop.eup %1812 }
 0x366   :  { %v807_v14 = vadd.f32 1.0, %v1813_v13 }
 0x367   :  { %1814 = vrcp.f32 %v797_v12 }
 0x368   :  { %1816 = vrcp.f32 %v807_v14 }
 0x371   :  { %v1815_v16 = vpop.eup %1814 }
 0x372   :  { %v811_v18 = vmul.f32 %v1815_v16, %v810_v15  ;;  %v1817_v20 = vpop.eup %1816 }
 0x373   :  { %v816_v21 = vsub.f32 1.0, %v1817_v20  ;;  %v818_v24 = vmul.f32 %v1817_v20, %v2245_v58  ;;  %v932_v20 = vld [vmem:[#allocation2 + $0x4] ss:$8 sm:$0x7] }
 0x374   :  { %v814_v19 = vadd.f32 %v812_v17, %v811_v18 }
 0x376   :  { %1818 = vtanh.f32 %v814_v19 }
 0x380   :  { %v1819_v22 = vpop.eup %1818 }
 0x381   :  { %v817_v23 = vmul.f32 %v1819_v22, %v816_v21 }
 0x383   :  { %v2286_v25 = vadd.f32 %v818_v24, %v817_v23 }
 0x385   :  { %v822_v27 = vpack.c.bf16 %v2286_v25, %v2286_v25 }
 0x387   :  { %856 = vmatmul.mubr.bf16.vlgmr.msra.gmra.mrb[16].mxu0 %v822_v27  ;;  %1634 = vmatmul.mubr.bf16.vlgmr.msra.gmra.mrb[16].mxu1 %v822_v27  ;;  %v1023_v27 = vrot.slane %v932_v20, 1 }
 0x388   :  { %935 = vmatpush1.bf16.msra.mxu0 %v2069_v28  ;;  %1638 = vmatpush3.bf16.msra.mxu1 %v2074_v30 }
 0x389   :  { %936 = vmatprep.subr.bf16.mxu0 %v2071_v29  ;;  %1639 = vmatprep.subr.bf16.mxu1 %v1975_v0 }
 0x38a   :  { %966 = vmatprep.mubr.bf16.mxu0 %v1976_v1  ;;  %1653 = vmatprep.mubr.msk.bf16.mxu1 %vm1977_vm0, %v1975_v0 }
 0x38c   :  { %937 = vmatpush1.bf16.msra.mxu0 %v2077_v31  ;;  %1640 = vmatpush3.bf16.msra.mxu1 %v2084_v33 }
 0x38d   :  { %938 = vmatprep.subr.bf16.mxu0 %v2080_v32  ;;  %1641 = vmatprep.subr.bf16.mxu1 %v1975_v0 }
 0x390   :  { %939 = vmatpush1.bf16.msra.mxu0 %v2091_v34  ;;  %1642 = vmatpush3.bf16.msra.mxu1 %v2097_v36 }
 0x391   :  { %940 = vmatprep.subr.bf16.mxu0 %v2094_v35  ;;  %1643 = vmatprep.subr.bf16.mxu1 %v1975_v0 }
 0x394   :  { %941 = vmatpush1.bf16.msra.mxu0 %v2101_v37  ;;  %1644 = vmatpush3.bf16.msra.mxu1 %v2107_v39 }
 0x395   :  { %942 = vmatprep.subr.bf16.mxu0 %v2104_v38  ;;  %1645 = vmatprep.subr.bf16.mxu1 %v1975_v0 }
 0x398   :  { %943 = vmatpush1.bf16.msra.mxu0 %v2111_v40  ;;  %1646 = vmatpush3.bf16.msra.mxu1 %v2117_v42 }
 0x399   :  { %944 = vmatprep.subr.bf16.mxu0 %v2114_v41  ;;  %1647 = vmatprep.subr.bf16.mxu1 %v1975_v0 }
 0x39c   :  { %945 = vmatpush1.bf16.msra.mxu0 %v2121_v43  ;;  %1648 = vmatpush3.bf16.msra.mxu1 %v2127_v45 }
 0x39d   :  { %946 = vmatprep.subr.bf16.mxu0 %v2124_v44  ;;  %1649 = vmatprep.subr.bf16.mxu1 %v1975_v0 }
 0x3a0   :  { %947 = vmatpush1.bf16.msra.mxu0 %v2131_v46  ;;  %1650 = vmatpush3.bf16.msra.mxu1 %v2137_v48 }
 0x3a1   :  { %948 = vmatprep.subr.bf16.mxu0 %v2134_v47  ;;  %1651 = vmatprep.subr.bf16.mxu1 %v1975_v0 }
 0x3a4   :  { %949 = vmatpush1.bf16.msra.mxu0 %v2141_v49  ;;  %1652 = vmatpush3.bf16.msra.mxu1 %v2150_v51 }
 0x3a5   :  { %1045 = vmatprep.subr.bf16.mxu0 %v2066_v26  ;;  %1657 = vmatprep.subr.bf16.mxu1 %v1975_v0 }
 0x45a   :  { %v857_v54 = vpop.f32.mrb[16].mxu0  ;;  %v898_v55 = vpop.f32.mrb[16].mxu1 }
 0x45b   :  { %v904_v56 = vadd.f32 %v857_v54, %v821_v52  ;;  %v859_v57 = vpop.f32.mrb[17].mxu0  ;;  %v1635_v58 = vpop.f32.mrb[17].mxu1  ;;  %v921_v8 = vadd.f32 %v898_v55, %v2200_v53 }
 0x45c   :  { %v861_v60 = vpop.f32.mrb[18].mxu0  ;;  %v901_v61 = vpop.f32.mrb[18].mxu1  ;;  %v914_v3 = vadd.f32 %v912_v59, %v859_v57 }
 0x45d   :  { %v1446_v62 = vmul.f32 -1.442695, %v904_v56  ;;  %v862_v63 = vpop.f32.mrb[19].mxu0  ;;  %v1636_v2 = vpop.f32.mrb[19].mxu1 }
 0x45e   :  { %v1447_v4 = vmul.f32 -1.442695, %v914_v3 }
 0x45f   :  { %1820 = vpow2.f32 %v1446_v62 }
 0x460   :  { %1822 = vpow2.f32 %v1447_v4  ;;  %v1034_v4 = vrot.slane %v932_v20, 2 }
 0x469   :  { %v1821_v50 = vpop.eup %1820 }
 0x46a   :  { %v908_v5 = vadd.f32 1.0, %v1821_v50  ;;  %v1823_v6 = vpop.eup %1822 }
 0x46b   :  { %v918_v7 = vadd.f32 1.0, %v1823_v6 }
 0x46c   :  { %1824 = vrcp.f32 %v908_v5 }
 0x46d   :  { %1826 = vrcp.f32 %v918_v7 }
 0x476   :  { %v1825_v9 = vpop.eup %1824 }
 0x477   :  { %v922_v11 = vmul.f32 %v1825_v9, %v921_v8  ;;  %v1827_v13 = vpop.eup %1826 }
 0x478   :  { %v927_v14 = vsub.f32 1.0, %v1827_v13  ;;  %v929_v17 = vmul.f32 %v1827_v13, %v2286_v25 }
 0x479   :  { %v925_v12 = vadd.f32 %v923_v10, %v922_v11 }
 0x47b   :  { %1828 = vtanh.f32 %v925_v12 }
 0x485   :  { %v1829_v15 = vpop.eup %1828 }
 0x486   :  { %v928_v16 = vmul.f32 %v1829_v15, %v927_v14 }
 0x488   :  { %v2327_v18 = vadd.f32 %v929_v17, %v928_v16 }
 0x48a   :  { %v933_v19 = vpack.c.bf16 %v2327_v18, %v2327_v18 }
 0x48c   :  { %967 = vmatmul.mubr.bf16.vlgmr.msra.gmra.mrb[20].mxu0 %v933_v19  ;;  %1654 = vmatmul.mubr.bf16.vlgmr.msra.gmra.mrb[20].mxu1 %v933_v19 }
 0x48d   :  { %1046 = vmatpush1.bf16.msra.mxu0 %v2069_v28  ;;  %1658 = vmatpush3.bf16.msra.mxu1 %v2074_v30 }
 0x48e   :  { %1047 = vmatprep.subr.bf16.mxu0 %v2071_v29  ;;  %1659 = vmatprep.subr.bf16.mxu1 %v1975_v0 }
 0x48f   :  { %1077 = vmatprep.mubr.bf16.mxu0 %v1976_v1  ;;  %1673 = vmatprep.mubr.msk.bf16.mxu1 %vm1977_vm0, %v1975_v0 }
 0x491   :  { %1048 = vmatpush1.bf16.msra.mxu0 %v2077_v31  ;;  %1660 = vmatpush3.bf16.msra.mxu1 %v2084_v33 }
 0x492   :  { %1049 = vmatprep.subr.bf16.mxu0 %v2080_v32  ;;  %1661 = vmatprep.subr.bf16.mxu1 %v1975_v0 }
 0x495   :  { %1050 = vmatpush1.bf16.msra.mxu0 %v2091_v34  ;;  %1662 = vmatpush3.bf16.msra.mxu1 %v2097_v36 }
 0x496   :  { %1051 = vmatprep.subr.bf16.mxu0 %v2094_v35  ;;  %1663 = vmatprep.subr.bf16.mxu1 %v1975_v0 }
 0x499   :  { %1052 = vmatpush1.bf16.msra.mxu0 %v2101_v37  ;;  %1664 = vmatpush3.bf16.msra.mxu1 %v2107_v39 }
 0x49a   :  { %1053 = vmatprep.subr.bf16.mxu0 %v2104_v38  ;;  %1665 = vmatprep.subr.bf16.mxu1 %v1975_v0 }
 0x49d   :  { %1054 = vmatpush1.bf16.msra.mxu0 %v2111_v40  ;;  %1666 = vmatpush3.bf16.msra.mxu1 %v2117_v42 }
 0x49e   :  { %1055 = vmatprep.subr.bf16.mxu0 %v2114_v41  ;;  %1667 = vmatprep.subr.bf16.mxu1 %v1975_v0 }
 0x4a1   :  { %1056 = vmatpush1.bf16.msra.mxu0 %v2121_v43  ;;  %1668 = vmatpush3.bf16.msra.mxu1 %v2127_v45 }
 0x4a2   :  { %1057 = vmatprep.subr.bf16.mxu0 %v2124_v44  ;;  %1669 = vmatprep.subr.bf16.mxu1 %v1975_v0 }
 0x4a5   :  { %1058 = vmatpush1.bf16.msra.mxu0 %v2131_v46  ;;  %1670 = vmatpush3.bf16.msra.mxu1 %v2137_v48 }
 0x4a6   :  { %1059 = vmatprep.subr.bf16.mxu0 %v2134_v47  ;;  %1671 = vmatprep.subr.bf16.mxu1 %v1975_v0 }
 0x4a9   :  { %1060 = vmatpush1.bf16.msra.mxu0 %v2141_v49  ;;  %1672 = vmatpush3.bf16.msra.mxu1 %v2150_v51 }
 0x4aa   :  { %1156 = vmatprep.subr.bf16.mxu0 %v2066_v26  ;;  %1677 = vmatprep.subr.bf16.mxu1 %v1975_v0 }
 0x55f   :  { %v968_v21 = vpop.f32.mrb[20].mxu0  ;;  %v1009_v22 = vpop.f32.mrb[20].mxu1 }
 0x560   :  { %v1015_v23 = vadd.f32 %v968_v21, %v932_v20  ;;  %v970_v24 = vpop.f32.mrb[21].mxu0  ;;  %v1655_v25 = vpop.f32.mrb[21].mxu1  ;;  %v1032_v2 = vadd.f32 %v1009_v22, %v2200_v53 }
 0x561   :  { %v972_v52 = vpop.f32.mrb[22].mxu0  ;;  %v1012_v54 = vpop.f32.mrb[22].mxu1  ;;  %v1025_v58 = vadd.f32 %v1023_v27, %v970_v24 }
 0x562   :  { %v1448_v55 = vmul.f32 -1.442695, %v1015_v23  ;;  %v973_v56 = vpop.f32.mrb[23].mxu0  ;;  %v1656_v57 = vpop.f32.mrb[23].mxu1 }
 0x563   :  { %v1449_v59 = vmul.f32 -1.442695, %v1025_v58 }
 0x564   :  { %1830 = vpow2.f32 %v1448_v55 }
 0x565   :  { %1832 = vpow2.f32 %v1449_v59 }
 0x56e   :  { %v1831_v60 = vpop.eup %1830 }
 0x56f   :  { %v1019_v61 = vadd.f32 1.0, %v1831_v60  ;;  %v1833_v62 = vpop.eup %1832 }
 0x570   :  { %v1029_v63 = vadd.f32 1.0, %v1833_v62  ;;  %v1870_v62 = vld [vmem:[#allocation8] ss:$12 sps:$4 sm:$0xff]  }
 0x571   :  { %1834 = vrcp.f32 %v1019_v61 }
 0x572   :  { %1836 = vrcp.f32 %v1029_v63  ;;  %v1871_v63 = vld [vmem:[#allocation8 + $0x8] ss:$12 sps:$4 sm:$0xff]  }
 0x57b   :  { %v1835_v3 = vpop.eup %1834 }
 0x57c   :  { %v1033_v50 = vmul.f32 %v1835_v3, %v1032_v2  ;;  %v1837_v6 = vpop.eup %1836  ;;  %v1872_v2 = vld [vmem:[#allocation8 + $0x1c] ss:$12 sps:$4 sm:$0xff]   ;;  %v1873_v3 = vld [vmem:[#allocation8 + $0x18] ss:$12 sps:$4 sm:$0xff]  }
 0x57d   :  { %v1038_v7 = vsub.f32 1.0, %v1837_v6  ;;  %v1040_v10 = vmul.f32 %v1837_v6, %v2327_v18 }
 0x57e   :  { %v1036_v5 = vadd.f32 %v1034_v4, %v1033_v50  ;;  %v1874_v4 = vld [vmem:[#allocation8 + $0x20] ss:$12 sps:$4 sm:$0xff]  }
 0x57f   :  { %v1875_v50 = vld [vmem:[#allocation8 + $0x34] ss:$12 sps:$4 sm:$0xff]  }
 0x580   :  { %1838 = vtanh.f32 %v1036_v5 }
 0x58a   :  { %v1839_v8 = vpop.eup %1838 }
 0x58b   :  { %v1039_v9 = vmul.f32 %v1839_v8, %v1038_v7 }
 0x58d   :  { %v2368_v11 = vadd.f32 %v1040_v10, %v1039_v9 }
 0x58f   :  { %v1044_v12 = vpack.c.bf16 %v2368_v11, %v2368_v11 }
 0x591   :  { %1078 = vmatmul.mubr.bf16.vlgmr.msra.gmra.mrb[24].mxu0 %v1044_v12  ;;  %1674 = vmatmul.mubr.bf16.vlgmr.msra.gmra.mrb[24].mxu1 %v1044_v12 }
 0x592   :  { %1157 = vmatpush1.bf16.msra.mxu0 %v2069_v28  ;;  %1678 = vmatpush3.bf16.msra.mxu1 %v2074_v30  ;;  %v1043_v28 = vld [vmem:[#allocation2 + $0x5] ss:$8 sm:$0x7] }
 0x593   :  { %1158 = vmatprep.subr.bf16.mxu0 %v2071_v29  ;;  %1679 = vmatprep.subr.bf16.mxu1 %v1975_v0  ;;  %v1134_v13 = vrot.slane %v1043_v28, 1  ;;  %v1145_v27 = vrot.slane %v1043_v28, 2 }
 0x594   :  { %1188 = vmatprep.mubr.bf16.mxu0 %v1976_v1  ;;  %1693 = vmatprep.mubr.msk.bf16.mxu1 %vm1977_vm0, %v1975_v0 }
 0x596   :  { %1159 = vmatpush1.bf16.msra.mxu0 %v2077_v31  ;;  %1680 = vmatpush3.bf16.msra.mxu1 %v2084_v33 }
 0x597   :  { %1160 = vmatprep.subr.bf16.mxu0 %v2080_v32  ;;  %1681 = vmatprep.subr.bf16.mxu1 %v1975_v0 }
 0x59a   :  { %1161 = vmatpush1.bf16.msra.mxu0 %v2091_v34  ;;  %1682 = vmatpush3.bf16.msra.mxu1 %v2097_v36 }
 0x59b   :  { %1162 = vmatprep.subr.bf16.mxu0 %v2094_v35  ;;  %1683 = vmatprep.subr.bf16.mxu1 %v1975_v0 }
 0x59e   :  { %1163 = vmatpush1.bf16.msra.mxu0 %v2101_v37  ;;  %1684 = vmatpush3.bf16.msra.mxu1 %v2107_v39 }
 0x59f   :  { %1164 = vmatprep.subr.bf16.mxu0 %v2104_v38  ;;  %1685 = vmatprep.subr.bf16.mxu1 %v1975_v0 }
 0x5a2   :  { %1165 = vmatpush1.bf16.msra.mxu0 %v2111_v40  ;;  %1686 = vmatpush3.bf16.msra.mxu1 %v2117_v42 }
 0x5a3   :  { %1166 = vmatprep.subr.bf16.mxu0 %v2114_v41  ;;  %1687 = vmatprep.subr.bf16.mxu1 %v1975_v0 }
 0x5a6   :  { %1167 = vmatpush1.bf16.msra.mxu0 %v2121_v43  ;;  %1688 = vmatpush3.bf16.msra.mxu1 %v2127_v45 }
 0x5a7   :  { %1168 = vmatprep.subr.bf16.mxu0 %v2124_v44  ;;  %1689 = vmatprep.subr.bf16.mxu1 %v1975_v0 }
 0x5aa   :  { %1169 = vmatpush1.bf16.msra.mxu0 %v2131_v46  ;;  %1690 = vmatpush3.bf16.msra.mxu1 %v2137_v48 }
 0x5ab   :  { %1170 = vmatprep.subr.bf16.mxu0 %v2134_v47  ;;  %1691 = vmatprep.subr.bf16.mxu1 %v1975_v0 }
 0x5ae   :  { %1171 = vmatpush1.bf16.msra.mxu0 %v2141_v49  ;;  %1692 = vmatpush3.bf16.msra.mxu1 %v2150_v51 }
 0x5af   :  { %1267 = vmatprep.subr.bf16.mxu0 %v2066_v26  ;;  %1697 = vmatprep.subr.bf16.mxu1 %v1975_v0 }
 0x664   :  { %v1079_v29 = vpop.f32.mrb[24].mxu0  ;;  %v1120_v30 = vpop.f32.mrb[24].mxu1 }
 0x665   :  { %v1126_v31 = vadd.f32 %v1079_v29, %v1043_v28  ;;  %v1081_v32 = vpop.f32.mrb[25].mxu0  ;;  %v1675_v33 = vpop.f32.mrb[25].mxu1  ;;  %v1143_v24 = vadd.f32 %v1120_v30, %v2200_v53 }
 0x666   :  { %v1083_v14 = vpop.f32.mrb[26].mxu0  ;;  %v1123_v15 = vpop.f32.mrb[26].mxu1  ;;  %v1136_v19 = vadd.f32 %v1134_v13, %v1081_v32 }
 0x667   :  { %v1450_v16 = vmul.f32 -1.442695, %v1126_v31  ;;  %v1084_v17 = vpop.f32.mrb[27].mxu0  ;;  %v1676_v18 = vpop.f32.mrb[27].mxu1 }
 0x668   :  { %v1451_v20 = vmul.f32 -1.442695, %v1136_v19  ;;  %v1265_v31 = vld [vmem:[#allocation2 + $0x7] ss:$8 sm:$0x7] }
 0x669   :  { %1840 = vpow2.f32 %v1450_v16  ;;  %v1356_v16 = vrot.slane %v1265_v31, 1 }
 0x66a   :  { %1842 = vpow2.f32 %v1451_v20 }
 0x673   :  { %v1841_v21 = vpop.eup %1840 }
 0x674   :  { %v1130_v26 = vadd.f32 1.0, %v1841_v21  ;;  %v1843_v22 = vpop.eup %1842 }
 0x675   :  { %v1140_v23 = vadd.f32 1.0, %v1843_v22 }
 0x676   :  { %1844 = vrcp.f32 %v1130_v26 }
 0x677   :  { %1846 = vrcp.f32 %v1140_v23 }
 0x680   :  { %v1845_v25 = vpop.eup %1844 }
 0x681   :  { %v1144_v52 = vmul.f32 %v1845_v25, %v1143_v24  ;;  %v1847_v55 = vpop.eup %1846 }
 0x682   :  { %v1149_v56 = vsub.f32 1.0, %v1847_v55  ;;  %v1151_v59 = vmul.f32 %v1847_v55, %v2368_v11  ;;  %v1367_v55 = vrot.slane %v1265_v31, 2 }
 0x683   :  { %v1147_v54 = vadd.f32 %v1145_v27, %v1144_v52 }
 0x685   :  { %1848 = vtanh.f32 %v1147_v54 }
 0x68f   :  { %v1849_v57 = vpop.eup %1848 }
 0x690   :  { %v1150_v58 = vmul.f32 %v1849_v57, %v1149_v56 }
 0x692   :  { %v2409_v60 = vadd.f32 %v1151_v59, %v1150_v58 }
 0x694   :  { %v1155_v61 = vpack.c.bf16 %v2409_v60, %v2409_v60 }
 0x696   :  { %1189 = vmatmul.mubr.bf16.vlgmr.msra.gmra.mrb[28].mxu0 %v1155_v61  ;;  %1694 = vmatmul.mubr.bf16.vlgmr.msra.gmra.mrb[28].mxu1 %v1155_v61 }
 0x697   :  { %1268 = vmatpush1.bf16.msra.mxu0 %v1870_v62  ;;  %1698 = vmatpush3.bf16.msra.mxu1 %v1871_v63 }
 0x698   :  { %1269 = vmatprep.subr.bf16.mxu0 %v1872_v2  ;;  %1699 = vmatprep.subr.bf16.mxu1 %v1975_v0 }
 0x699   :  { %1299 = vmatprep.mubr.bf16.mxu0 %v1976_v1  ;;  %1713 = vmatprep.mubr.msk.bf16.mxu1 %vm1977_vm0, %v1975_v0  ;;  %v1154_v1 = vld [vmem:[#allocation2 + $0x6] ss:$8 sm:$0x7] }
 0x69a   :  { %v1256_v6 = vrot.slane %v1154_v1, 2 }
 0x69b   :  { %1270 = vmatpush1.bf16.msra.mxu0 %v1873_v3  ;;  %1700 = vmatpush3.bf16.msra.mxu1 %v1874_v4 }
 0x69c   :  { %1271 = vmatprep.subr.bf16.mxu0 %v1875_v50  ;;  %1701 = vmatprep.subr.bf16.mxu1 %v1975_v0 }
 0x69f   :  { %1272 = vmatpush1.bf16.msra.mxu0 %v2091_v34  ;;  %1702 = vmatpush3.bf16.msra.mxu1 %v2097_v36 }
 0x6a0   :  { %1273 = vmatprep.subr.bf16.mxu0 %v2094_v35  ;;  %1703 = vmatprep.subr.bf16.mxu1 %v1975_v0 }
 0x6a3   :  { %1274 = vmatpush1.bf16.msra.mxu0 %v2101_v37  ;;  %1704 = vmatpush3.bf16.msra.mxu1 %v2107_v39  ;;  %v1245_v39 = vrot.slane %v1154_v1, 1 }
 0x6a4   :  { %1275 = vmatprep.subr.bf16.mxu0 %v2104_v38  ;;  %1705 = vmatprep.subr.bf16.mxu1 %v1975_v0 }
 0x6a7   :  { %1276 = vmatpush1.bf16.msra.mxu0 %v2111_v40  ;;  %1706 = vmatpush3.bf16.msra.mxu1 %v2117_v42 }
 0x6a8   :  { %1277 = vmatprep.subr.bf16.mxu0 %v2114_v41  ;;  %1707 = vmatprep.subr.bf16.mxu1 %v1975_v0 }
 0x6ab   :  { %1278 = vmatpush1.bf16.msra.mxu0 %v2121_v43  ;;  %1708 = vmatpush3.bf16.msra.mxu1 %v2127_v45 }
 0x6ac   :  { %1279 = vmatprep.subr.bf16.mxu0 %v2124_v44  ;;  %1709 = vmatprep.subr.bf16.mxu1 %v1975_v0 }
 0x6af   :  { %1280 = vmatpush1.bf16.msra.mxu0 %v2131_v46  ;;  %1710 = vmatpush3.bf16.msra.mxu1 %v2137_v48 }
 0x6b0   :  { %1281 = vmatprep.subr.bf16.mxu0 %v2134_v47  ;;  %1711 = vmatprep.subr.bf16.mxu1 %v1975_v0 }
 0x6b3   :  { %1282 = vmatpush1.bf16.msra.mxu0 %v2141_v49  ;;  %1712 = vmatpush3.bf16.msra.mxu1 %v2150_v51 }
 0x769   :  { %v1190_v34 = vpop.f32.mrb[28].mxu0  ;;  %v1231_v35 = vpop.f32.mrb[28].mxu1 }
 0x76a   :  { %v1237_v36 = vadd.f32 %v1190_v34, %v1154_v1  ;;  %v1192_v37 = vpop.f32.mrb[29].mxu0  ;;  %v1695_v38 = vpop.f32.mrb[29].mxu1  ;;  %v1254_v51 = vadd.f32 %v1231_v35, %v2200_v53 }
 0x76b   :  { %v1194_v40 = vpop.f32.mrb[30].mxu0  ;;  %v1234_v41 = vpop.f32.mrb[30].mxu1  ;;  %v1247_v45 = vadd.f32 %v1245_v39, %v1192_v37 }
 0x76c   :  { %v1452_v42 = vmul.f32 -1.442695, %v1237_v36  ;;  %v1195_v43 = vpop.f32.mrb[31].mxu0  ;;  %v1696_v44 = vpop.f32.mrb[31].mxu1 }
 0x76d   :  { %v1453_v46 = vmul.f32 -1.442695, %v1247_v45 }
 0x76e   :  { %1850 = vpow2.f32 %v1452_v42 }
 0x76f   :  { %1852 = vpow2.f32 %v1453_v46 }
 0x778   :  { %v1851_v0 = vpop.eup %1850 }
 0x779   :  { %v1241_v47 = vadd.f32 1.0, %v1851_v0  ;;  %v1853_v48 = vpop.eup %1852 }
 0x77a   :  { %v1251_v49 = vadd.f32 1.0, %v1853_v48 }
 0x77b   :  { %1854 = vrcp.f32 %v1241_v47 }
 0x77c   :  { %1856 = vrcp.f32 %v1251_v49 }
 0x785   :  { %v1855_v5 = vpop.eup %1854 }
 0x786   :  { %v1255_v7 = vmul.f32 %v1855_v5, %v1254_v51  ;;  %v1857_v9 = vpop.eup %1856 }
 0x787   :  { %v1260_v10 = vsub.f32 1.0, %v1857_v9  ;;  %v1262_v28 = vmul.f32 %v1857_v9, %v2409_v60 }
 0x788   :  { %v1258_v8 = vadd.f32 %v1256_v6, %v1255_v7 }
 0x78a   :  { %1858 = vtanh.f32 %v1258_v8 }
 0x794   :  { %v1859_v11 = vpop.eup %1858 }
 0x795   :  { %v1261_v12 = vmul.f32 %v1859_v11, %v1260_v10 }
 0x797   :  { %v1263_v29 = vadd.f32 %v1262_v28, %v1261_v12 }
 0x799   :  { %v1266_v30 = vpack.c.bf16 %v1263_v29, %v1263_v29 }
 0x79b   :  { %1300 = vmatmul.mubr.bf16.vlgmr.msra.gmra.mrb[32].mxu0 %v1266_v30  ;;  %1714 = vmatmul.mubr.bf16.vlgmr.msra.gmra.mrb[32].mxu1 %v1266_v30 }
 0x86e   :  { %v1301_v32 = vpop.f32.mrb[32].mxu0  ;;  %v1342_v33 = vpop.f32.mrb[32].mxu1 }
 0x86f   :  { %v1348_v13 = vadd.f32 %v1301_v32, %v1265_v31  ;;  %v1303_v14 = vpop.f32.mrb[33].mxu0  ;;  %v1715_v15 = vpop.f32.mrb[33].mxu1  ;;  %v1365_v52 = vadd.f32 %v1342_v33, %v2200_v53 }
 0x870   :  { %v1305_v17 = vpop.f32.mrb[34].mxu0  ;;  %v1345_v18 = vpop.f32.mrb[34].mxu1  ;;  %v1358_v26 = vadd.f32 %v1356_v16, %v1303_v14 }
 0x871   :  { %v1454_v19 = vmul.f32 -1.442695, %v1348_v13  ;;  %v1306_v20 = vpop.f32.mrb[35].mxu0  ;;  %v1716_v21 = vpop.f32.mrb[35].mxu1 }
 0x872   :  { %v1455_v22 = vmul.f32 -1.442695, %v1358_v26 }
 0x873   :  { %1860 = vpow2.f32 %v1454_v19 }
 0x874   :  { %1862 = vpow2.f32 %v1455_v22 }
 0x87d   :  { %v1861_v23 = vpop.eup %1860 }
 0x87e   :  { %v1352_v24 = vadd.f32 1.0, %v1861_v23  ;;  %v1863_v25 = vpop.eup %1862 }
 0x87f   :  { %v1362_v27 = vadd.f32 1.0, %v1863_v25 }
 0x880   :  { %1864 = vrcp.f32 %v1352_v24 }
 0x881   :  { %1866 = vrcp.f32 %v1362_v27 }
 0x88a   :  { %v1865_v54 = vpop.eup %1864 }
 0x88b   :  { %v1366_v56 = vmul.f32 %v1865_v54, %v1365_v52  ;;  %v1867_v58 = vpop.eup %1866 }
 0x88c   :  { %v1371_v59 = vsub.f32 1.0, %v1867_v58  ;;  %v1373_v62 = vmul.f32 %v1867_v58, %v1263_v29 }
 0x88d   :  { %v1369_v57 = vadd.f32 %v1367_v55, %v1366_v56 }
 0x88f   :  { %1868 = vtanh.f32 %v1369_v57 }
 0x899   :  { %v1869_v60 = vpop.eup %1868 }
 0x89a   :  { %v1372_v61 = vmul.f32 %v1869_v60, %v1371_v59 }
 0x89c   :  { %v1374_v63 = vadd.f32 %v1373_v62, %v1372_v61 }
 0x89e   :  { %1375 = vst [vmem:[#allocation9] sm:$0x1] %v1374_v63 }
 0x89f   :  { %1953 = shalt.err (!%p1950_p0)
}
 0x8a0   :  { %s1954_s17 = scalar_lea.hbm %s2461_s6, 16 }
 0x8a1   :  { %p1955_p1 = scmp.ne.s32.totalorder %s2461_s6, %s1954_s17  ;;  %p1958_p2 = scmp.lt.u32.totalorder %s1954_s17, %s2461_s6 }
 0x8a3   :  { %p1960_p3 = pnand %p1958_p2, %p1955_p1 }
 0x8a5   :  { %1963 = shalt.err (!%p1960_p3)
}
 0x8a6   :  { %1385 = dma.vmem_to_hbm [thread:$0]  %s1383_s12, 16, %s2461_s6, [#allocation5]  }
 0x8a7   :  { %1968 = dma.done.wait [#allocation5], 16  }
 0x8a8   :  { %1969 = vsyncadd [#allocation5], 4294967280 }
 0x8a9   :  { %1389 = vsyncpa [#allocation4], 1 }
 0x8aa   :  { %1390 = vsyncpa [#allocation7], 1 }
 0x8ab   :  { %1391 = vsyncpa [#allocation5], 1 }

</bundles_post_ra>
